<compile_context>
chip_gen: v6e
topology: v6e:2x2x1
jax: 0.10.0
libtpu: 0.0.40
codegen_flags: <defaults>
</compile_context>

<pallas_src>
import jax
import jax.numpy as jnp
from jax.experimental import pallas as pl
from jax.experimental.pallas import tpu as pltpu


# ---------------------------------------------------------------------------
# Stage 1: fused elementwise AAF front-end (mul, sub, permute+concat) kernel
# ---------------------------------------------------------------------------

def _aaf_fusion_kernel(q_ref, s_ref, had_ref, sub_ref, cat_ref):
    """Per (b, n, chunk) tile.

    q_ref   : (r_block, L)    query chunk for (b, n)
    s_ref   : (r_block, L)    support chunk for (n, b)  (permute via index_map)
    had_ref : (r_block, L)    q * s
    sub_ref : (r_block, L)    q - s
    cat_ref : (2, r_block, L) channel-concat halves: [0]=q, [1]=s
    """
    q = q_ref[...]
    s = s_ref[...]
    had_ref[...] = q * s
    sub_ref[...] = q - s
    cat_ref[0, :, :] = q
    cat_ref[1, :, :] = s


def _choose_tiling(F, itemsize, max_lane=2048, target_bytes=1024 * 1024):
    """Pick (R, L, r_block) with F == R * L.

    L is the lane dim: the largest divisor of F that is a multiple of 128 and
    <= max_lane (lane-dense stores).  R is chunked by r_block (a multiple of 8,
    or the full dim R, to satisfy the (8,128) block rule) so one chunk is about
    target_bytes per buffer: small enough for default scoped-VMEM limits, large
    enough to amortize the ~0.35us per-grid-step overhead.
    """
    L = None
    start = (min(F, max_lane) // 128) * 128
    for cand in range(start, 127, -128):
        if F % cand == 0:
            L = cand
            break
    if L is None:
        # F not a multiple of 128: single full-F row per (b, n) (full-dim block is legal).
        return 1, F, 1
    R = F // L
    target_rows = max(1, target_bytes // (L * itemsize))
    best = None
    for d in range(1, R + 1):
        if R % d == 0 and d <= target_rows and d % 8 == 0:
            best = d
    r_block = best if best is not None else R   # full dim is always legal
    return R, L, r_block


def aaf_fusion_inputs(query, support):
    """query [B,Ns,C,H,W], support [Ns,B,C,H,W] ->
       (query*s_perm, query-s_perm, cat([query, s_perm], ch)) — one fused Pallas pass."""
    B, Ns, C, H, W = query.shape
    Ns2, B2, C2, H2, W2 = support.shape
    assert (Ns2, B2, C2) == (Ns, B, C)
    assert (H2, W2) == (H, W), "Incompatible attention for this fusion module"
    assert query.dtype == support.dtype

    F = C * H * W
    R, L, r_block = _choose_tiling(F, jnp.dtype(query.dtype).itemsize)

    qr = query.reshape(B, Ns, R, L)        # free reshape (contiguous)
    sr = support.reshape(Ns, B, R, L)      # free reshape (contiguous)
    grid = (B, Ns, R // r_block)

    in_block = (pl.Squeezed(), pl.Squeezed(), r_block, L)
    out_block = (pl.Squeezed(), pl.Squeezed(), r_block, L)
    cat_block = (pl.Squeezed(), pl.Squeezed(), 2, r_block, L)

    q_spec = pl.BlockSpec(in_block, lambda b, n, r: (b, n, r, 0))
    # support is [Ns, B, ...]: swapped block indices realize permute(1,0,2,3,4)
    s_spec = pl.BlockSpec(in_block, lambda b, n, r: (n, b, r, 0))
    had_spec = pl.BlockSpec(out_block, lambda b, n, r: (b, n, r, 0))
    sub_spec = pl.BlockSpec(out_block, lambda b, n, r: (b, n, r, 0))
    cat_spec = pl.BlockSpec(cat_block, lambda b, n, r: (b, n, 0, r, 0))

    had, sub, cat = pl.pallas_call(
        _aaf_fusion_kernel,
        out_shape=(
            jax.ShapeDtypeStruct((B, Ns, R, L), query.dtype),
            jax.ShapeDtypeStruct((B, Ns, R, L), query.dtype),
            jax.ShapeDtypeStruct((B, Ns, 2, R, L), query.dtype),
        ),
        grid_spec=pltpu.PrefetchScalarGridSpec(
            num_scalar_prefetch=0,
            grid=grid,
            in_specs=[q_spec, s_spec],
            out_specs=[had_spec, sub_spec, cat_spec],
        ),
        compiler_params=pltpu.CompilerParams(
            dimension_semantics=("parallel", "parallel", "parallel"),
        ),
    )(qr, sr)

    # All reshapes below are contiguity-preserving (free).
    had = had.reshape(B, Ns, C, H, W)
    sub = sub.reshape(B, Ns, C, H, W)
    cat = cat.reshape(B, Ns, 2 * C, H, W)
    return had, sub, cat


# ---------------------------------------------------------------------------
# Stage 2: Conv3x3 + ReLU as a Pallas matmul (im2col) kernel
# ---------------------------------------------------------------------------

def _matmul_bias_relu_kernel(x_ref, w_ref, b_ref, o_ref, acc_ref):
    """o = relu(x @ w + b); K-tiled with f32 accumulator.

    x (tm, tk), w (tk, N), b (1, N), o (tm, N), acc (tm, N) f32 scratch.
    """
    k = pl.program_id(1)

    @pl.when(k == 0)
    def _():
        acc_ref[...] = jnp.zeros_like(acc_ref)

    acc_ref[...] += jnp.dot(x_ref[...], w_ref[...],
                            preferred_element_type=jnp.float32)

    @pl.when(k == pl.num_programs(1) - 1)
    def _():
        o_ref[...] = jnp.maximum(acc_ref[...] + b_ref[...], 0.0).astype(o_ref.dtype)


def _pick_row_tile(M, cap=256):
    for d in range(min(M, cap), 0, -1):
        if M % d == 0 and (d % 8 == 0 or d == M):
            return d
    return M


def _pick_k_tile(K, cap=1024):
    if K <= cap:
        return K
    for d in range(cap, 0, -1):
        if K % d == 0 and d % 128 == 0:
            return d
    for d in range(cap, 0, -1):
        if K % d == 0:
            return d
    return K


def matmul_bias_relu(x, w, b):
    """relu(x @ w + b) on the MXU. x [M,K], w [K,N], b [1,N] -> [M,N]."""
    M, K = x.shape
    K2, N = w.shape
    assert K2 == K and b.shape == (1, N)
    tm = _pick_row_tile(M)
    tk = _pick_k_tile(K)
    return pl.pallas_call(
        _matmul_bias_relu_kernel,
        out_shape=jax.ShapeDtypeStruct((M, N), x.dtype),
        grid_spec=pltpu.PrefetchScalarGridSpec(
            num_scalar_prefetch=0,
            grid=(M // tm, K // tk),
            in_specs=[
                pl.BlockSpec((tm, tk), lambda i, k: (i, k)),
                pl.BlockSpec((tk, N), lambda i, k: (k, 0)),
                pl.BlockSpec((1, N), lambda i, k: (0, 0)),
            ],
            out_specs=pl.BlockSpec((tm, N), lambda i, k: (i, 0)),
            scratch_shapes=[pltpu.VMEM((tm, N), jnp.float32)],
        ),
        compiler_params=pltpu.CompilerParams(
            dimension_semantics=("parallel", "arbitrary"),
        ),
    )(x, w, b)


def conv3x3_relu(x, w, b):
    """3x3 'same' conv + ReLU on [B, Ns, Cin, H, W]; weight [Cout, Cin, 3, 3]."""
    B, Ns, Cin, H, W = x.shape
    Cout = w.shape[0]
    x4 = x.reshape(B * Ns, Cin, H, W)
    xp = jnp.pad(x4, ((0, 0), (0, 0), (1, 1), (1, 1)))
    # im2col: [B*Ns, Cin, 9, H, W]; patch index dh*3+dw matches OIHW weight flatten.
    patches = jnp.stack(
        [xp[:, :, dh:dh + H, dw:dw + W] for dh in range(3) for dw in range(3)],
        axis=2,
    )
    X = patches.transpose(0, 3, 4, 1, 2).reshape(B * Ns * H * W, Cin * 9)
    Wm = w.reshape(Cout, Cin * 9).T                     # [Cin*9, Cout]
    Y = matmul_bias_relu(X, Wm, b.reshape(1, Cout))     # [B*Ns*H*W, Cout]
    y = Y.reshape(B * Ns, H, W, Cout).transpose(0, 3, 1, 2)
    return y.reshape(B, Ns, Cout, H, W)


# ---------------------------------------------------------------------------
# META_FASTER forward
# ---------------------------------------------------------------------------

@jax.jit
def meta_faster_level(query, support, params):
    had_in, sub_in, cat_in = aaf_fusion_inputs(query, support)
    hadamard = conv3x3_relu(had_in, params["w_h"], params["b_h"])
    subtract = conv3x3_relu(sub_in, params["w_s"], params["b_s"])
    concat = conv3x3_relu(cat_in, params["w_c"], params["b_c"])
    return jnp.concatenate([hadamard, subtract, concat], axis=2)


def meta_faster_forward(features, params):
    """JAX counterpart of META_FASTER.forward on the features dict."""
    query_features = features["query_p2"]      # List[ [B, Ns, C, H, W] ]
    support_features = features["support_p2"]  # List[ [Ns, B, C, H, W] ]
    merged = [meta_faster_level(q, s, params)
              for q, s in zip(query_features, support_features)]
    out = dict(features)
    out["output_features"] = merged
    return out


# ---------------------------------------------------------------------------
# Reference (pure JAX, lax.conv) for the in-script correctness check
# ---------------------------------------------------------------------------

def reference_forward(query, support, params):
    s = jnp.transpose(support, (1, 0, 2, 3, 4))

    def net(x, w, b):
        Bx, Nx = x.shape[:2]
        x4 = x.reshape((Bx * Nx,) + x.shape[2:])
        y = jax.lax.conv_general_dilated(
            x4, w, window_strides=(1, 1), padding="SAME",
            dimension_numbers=("NCHW", "OIHW", "NCHW"),
            precision=jax.lax.Precision.HIGHEST)
        y = jnp.maximum(y + b[None, :, None, None], 0.0)
        return y.reshape((Bx, Nx) + y.shape[1:])

    hadamard = net(query * s, params["w_h"], params["b_h"])
    subtract = net(query - s, params["w_s"], params["b_s"])
    concat = net(jnp.concatenate([query, s], axis=2), params["w_c"], params["b_c"])
    return jnp.concatenate([hadamard, subtract, concat], axis=2)


if __name__ == "__main__":
    key = jax.random.PRNGKey(0)
    B, Ns, C, H, W = 2, 3, 4, 16, 16  # small synthetic shapes (module default C=256)

    kq, ks, kwh, kbh, kws, kbs, kwc, kbc = jax.random.split(key, 8)
    query = jax.random.normal(kq, (B, Ns, C, H, W), dtype=jnp.float32)
    support = jax.random.normal(ks, (Ns, B, C, H, W), dtype=jnp.float32)
    params = {
        "w_h": 0.1 * jax.random.normal(kwh, (C, C, 3, 3), dtype=jnp.float32),
        "b_h": 0.1 * jax.random.normal(kbh, (C,), dtype=jnp.float32),
        "w_s": 0.1 * jax.random.normal(kws, (C, C, 3, 3), dtype=jnp.float32),
        "b_s": 0.1 * jax.random.normal(kbs, (C,), dtype=jnp.float32),
        "w_c": 0.1 * jax.random.normal(kwc, (2 * C, 2 * C, 3, 3), dtype=jnp.float32),
        "b_c": 0.1 * jax.random.normal(kbc, (2 * C,), dtype=jnp.float32),
    }

    features = {
        "query_p2": [query],
        "support_p2": [support],
        "support_targets": None,  # unused by META_FASTER fusion math
    }

    out_features = meta_faster_forward(features, params)
    out = out_features["output_features"][0]
    jax.block_until_ready(out)

    # Check 1 (exact): fused mul / sub / permute+concat front-end kernel.
    had_in, sub_in, cat_in = aaf_fusion_inputs(query, support)
    s_perm = jnp.transpose(support, (1, 0, 2, 3, 4))
    assert jnp.array_equal(cat_in, jnp.concatenate([query, s_perm], axis=2))
    assert jnp.allclose(had_in, query * s_perm)
    assert jnp.array_equal(sub_in, query - s_perm)

    # Check 2: end-to-end against plain-JAX reference (lax.conv, highest precision).
    ref = reference_forward(query, support, params)
    assert out.shape == (B, Ns, 4 * C, H, W)
    assert jnp.allclose(out, ref, atol=1e-3, rtol=1e-3), float(jnp.max(jnp.abs(out - ref)))

    print("KERNEL_OK")
</pallas_src>

<mosaic_0001>
module attributes {stable_mosaic.version = 11 : i64} {
  func.func @_aaf_fusion_kernel(%arg0: i32, %arg1: i32, %arg2: i32, %arg3: memref<1x1x1x1024xf32, #tpu.memory_space<vmem>>, %arg4: memref<1x1x1x1024xf32, #tpu.memory_space<vmem>>, %arg5: memref<1x1x1x1024xf32, #tpu.memory_space<vmem>>, %arg6: memref<1x1x1x1024xf32, #tpu.memory_space<vmem>>, %arg7: memref<1x1x2x1x1024xf32, #tpu.memory_space<vmem>>) attributes {dimension_semantics = [#tpu.dimension_semantics<parallel>, #tpu.dimension_semantics<parallel>, #tpu.dimension_semantics<parallel>], iteration_bounds = array<i64: 2, 3, 1>, scalar_prefetch = 0 : i64, scratch_operands = 0 : i64, tpu.core_type = #tpu.core_type<tc>, window_params = [{transform_indices = @transform_0, window_bounds = array<i64: 1, 1, 1, 1024>}, {transform_indices = @transform_1, window_bounds = array<i64: 1, 1, 1, 1024>}, {transform_indices = @transform_2, window_bounds = array<i64: 1, 1, 1, 1024>}, {transform_indices = @transform_3, window_bounds = array<i64: 1, 1, 1, 1024>}, {transform_indices = @transform_4, window_bounds = array<i64: 1, 1, 2, 1, 1024>}]} {
    %c0 = arith.constant 0 : index
    %c0_0 = arith.constant 0 : index
    %c0_1 = arith.constant 0 : index
    %c0_2 = arith.constant 0 : index
    %0 = vector.load %arg3[%c0, %c0_0, %c0_1, %c0_2] : memref<1x1x1x1024xf32, #tpu.memory_space<vmem>>, vector<1x1x1x1024xf32>
    %1 = vector.shape_cast %0 : vector<1x1x1x1024xf32> to vector<1x1024xf32>
    %c0_3 = arith.constant 0 : index
    %c0_4 = arith.constant 0 : index
    %c0_5 = arith.constant 0 : index
    %c0_6 = arith.constant 0 : index
    %2 = vector.load %arg4[%c0_3, %c0_4, %c0_5, %c0_6] : memref<1x1x1x1024xf32, #tpu.memory_space<vmem>>, vector<1x1x1x1024xf32>
    %3 = vector.shape_cast %2 : vector<1x1x1x1024xf32> to vector<1x1024xf32>
    %4 = arith.mulf %1, %3 : vector<1x1024xf32>
    %c0_7 = arith.constant 0 : index
    %c0_8 = arith.constant 0 : index
    %c0_9 = arith.constant 0 : index
    %c0_10 = arith.constant 0 : index
    %5 = vector.load %arg5[%c0_7, %c0_8, %c0_9, %c0_10] : memref<1x1x1x1024xf32, #tpu.memory_space<vmem>>, vector<1x1x1x1024xf32>
    %6 = vector.shape_cast %5 : vector<1x1x1x1024xf32> to vector<1x1024xf32>
    %7 = vector.shape_cast %4 : vector<1x1024xf32> to vector<1x1x1x1024xf32>
    tpu.vector_store %arg5[%c0_7, %c0_8, %c0_9, %c0_10], %7 {strides = array<i32>} : memref<1x1x1x1024xf32, #tpu.memory_space<vmem>>, vector<1x1x1x1024xf32>,
    %8 = arith.subf %1, %3 : vector<1x1024xf32>
    %c0_11 = arith.constant 0 : index
    %c0_12 = arith.constant 0 : index
    %c0_13 = arith.constant 0 : index
    %c0_14 = arith.constant 0 : index
    %9 = vector.load %arg6[%c0_11, %c0_12, %c0_13, %c0_14] : memref<1x1x1x1024xf32, #tpu.memory_space<vmem>>, vector<1x1x1x1024xf32>
    %10 = vector.shape_cast %9 : vector<1x1x1x1024xf32> to vector<1x1024xf32>
    %11 = vector.shape_cast %8 : vector<1x1024xf32> to vector<1x1x1x1024xf32>
    tpu.vector_store %arg6[%c0_11, %c0_12, %c0_13, %c0_14], %11 {strides = array<i32>} : memref<1x1x1x1024xf32, #tpu.memory_space<vmem>>, vector<1x1x1x1024xf32>,
    %c0_15 = arith.constant 0 : index
    %c0_16 = arith.constant 0 : index
    %c0_17 = arith.constant 0 : index
    %c0_18 = arith.constant 0 : index
    %c0_19 = arith.constant 0 : index
    %12 = vector.load %arg7[%c0_15, %c0_16, %c0_17, %c0_18, %c0_19] : memref<1x1x2x1x1024xf32, #tpu.memory_space<vmem>>, vector<1x1x1x1x1024xf32>
    %13 = vector.shape_cast %12 : vector<1x1x1x1x1024xf32> to vector<1x1024xf32>
    %14 = vector.shape_cast %1 : vector<1x1024xf32> to vector<1x1x1x1x1024xf32>
    tpu.vector_store %arg7[%c0_15, %c0_16, %c0_17, %c0_18, %c0_19], %14 {strides = array<i32>} : memref<1x1x2x1x1024xf32, #tpu.memory_space<vmem>>, vector<1x1x1x1x1024xf32>,
    %c0_20 = arith.constant 0 : index
    %c0_21 = arith.constant 0 : index
    %c1 = arith.constant 1 : index
    %c0_22 = arith.constant 0 : index
    %c0_23 = arith.constant 0 : index
    %15 = vector.load %arg7[%c0_20, %c0_21, %c1, %c0_22, %c0_23] : memref<1x1x2x1x1024xf32, #tpu.memory_space<vmem>>, vector<1x1x1x1x1024xf32>
    %16 = vector.shape_cast %15 : vector<1x1x1x1x1024xf32> to vector<1x1024xf32>
    %17 = vector.shape_cast %3 : vector<1x1024xf32> to vector<1x1x1x1x1024xf32>
    tpu.vector_store %arg7[%c0_20, %c0_21, %c1, %c0_22, %c0_23], %17 {strides = array<i32>} : memref<1x1x2x1x1024xf32, #tpu.memory_space<vmem>>, vector<1x1x1x1x1024xf32>,
    return
  }
  func.func @transform_0(%arg0: i32, %arg1: i32, %arg2: i32) -> (i32, i32, i32, i32) {
    %c0_i32 = arith.constant 0 : i32
    %c0_i32_0 = arith.constant 0 : i32
    return %arg0, %arg1, %arg2, %c0_i32 : i32, i32, i32, i32
  }
  func.func @transform_1(%arg0: i32, %arg1: i32, %arg2: i32) -> (i32, i32, i32, i32) {
    %c0_i32 = arith.constant 0 : i32
    %c0_i32_0 = arith.constant 0 : i32
    return %arg1, %arg0, %arg2, %c0_i32 : i32, i32, i32, i32
  }
  func.func @transform_2(%arg0: i32, %arg1: i32, %arg2: i32) -> (i32, i32, i32, i32) {
    %c0_i32 = arith.constant 0 : i32
    %c0_i32_0 = arith.constant 0 : i32
    return %arg0, %arg1, %arg2, %c0_i32 : i32, i32, i32, i32
  }
  func.func @transform_3(%arg0: i32, %arg1: i32, %arg2: i32) -> (i32, i32, i32, i32) {
    %c0_i32 = arith.constant 0 : i32
    %c0_i32_0 = arith.constant 0 : i32
    return %arg0, %arg1, %arg2, %c0_i32 : i32, i32, i32, i32
  }
  func.func @transform_4(%arg0: i32, %arg1: i32, %arg2: i32) -> (i32, i32, i32, i32, i32) {
    %c0_i32 = arith.constant 0 : i32
    %c0_i32_0 = arith.constant 0 : i32
    %c0_i32_1 = arith.constant 0 : i32
    return %arg0, %arg1, %c0_i32, %arg2, %c0_i32_0 : i32, i32, i32, i32, i32
  }
}

module attributes {stable_mosaic.version = 11 : i64} {
  func.func @_matmul_bias_relu_kernel(%arg0: i32, %arg1: i32, %arg2: memref<256x72xf32, #tpu.memory_space<vmem>>, %arg3: memref<72x8xf32, #tpu.memory_space<vmem>>, %arg4: memref<1x8xf32, #tpu.memory_space<vmem>>, %arg5: memref<256x8xf32, #tpu.memory_space<vmem>>, %arg6: memref<256x8xf32, #tpu.memory_space<vmem>>) attributes {dimension_semantics = [#tpu.dimension_semantics<parallel>, #tpu.dimension_semantics<arbitrary>], iteration_bounds = array<i64: 6, 1>, scalar_prefetch = 0 : i64, scratch_operands = 1 : i64, tpu.core_type = #tpu.core_type<tc>, window_params = [{transform_indices = @transform_0, window_bounds = array<i64: 256, 72>}, {transform_indices = @transform_1, window_bounds = array<i64: 72, 8>}, {pipeline_mode = #tpu.pipeline_mode<synchronous>, transform_indices = @transform_2, window_bounds = array<i64: 1, 8>}, {transform_indices = @transform_3, window_bounds = array<i64: 256, 8>}]} {
    %c0_i32 = arith.constant 0 : i32
    %0 = arith.cmpi eq, %arg1, %c0_i32 : i32
    %1 = arith.extui %0 : i1 to i32
    %c0_i32_0 = arith.constant 0 : i32
    %2 = arith.cmpi ne, %1, %c0_i32_0 : i32
    scf.if %2 {
      %cst_10 = arith.constant 0.000000e+00 : f32
      %12 = vector.broadcast %cst_10 : f32 to vector<256x8xf32>
      %c0_11 = arith.constant 0 : index
      %c0_12 = arith.constant 0 : index
      %13 = vector.load %arg6[%c0_11, %c0_12] : memref<256x8xf32, #tpu.memory_space<vmem>>, vector<256x8xf32>
      tpu.vector_store %arg6[%c0_11, %c0_12], %12 {strides = array<i32>} : memref<256x8xf32, #tpu.memory_space<vmem>>, vector<256x8xf32>,
    } else {
    }
    %c0 = arith.constant 0 : index
    %c0_1 = arith.constant 0 : index
    %3 = vector.load %arg6[%c0, %c0_1] : memref<256x8xf32, #tpu.memory_space<vmem>>, vector<256x8xf32>
    %c0_2 = arith.constant 0 : index
    %c0_3 = arith.constant 0 : index
    %4 = vector.load %arg2[%c0_2, %c0_3] : memref<256x72xf32, #tpu.memory_space<vmem>>, vector<256x72xf32>
    %c0_4 = arith.constant 0 : index
    %c0_5 = arith.constant 0 : index
    %5 = vector.load %arg3[%c0_4, %c0_5] : memref<72x8xf32, #tpu.memory_space<vmem>>, vector<72x8xf32>
    %cst = arith.constant dense<0.000000e+00> : vector<256x8xf32>
    %6 = tpu.matmul %4, %5, %cst {dimension_numbers = #tpu.dot_dimension_numbers<[1], [0], [0], [1], [0, 0, 1, 1], [], []>} : vector<256x72xf32>, vector<72x8xf32>, vector<256x8xf32> -> vector<256x8xf32>
    %7 = arith.addf %3, %6 : vector<256x8xf32>
    %c0_6 = arith.constant 0 : index
    %c0_7 = arith.constant 0 : index
    %8 = vector.load %arg6[%c0_6, %c0_7] : memref<256x8xf32, #tpu.memory_space<vmem>>, vector<256x8xf32>
    tpu.vector_store %arg6[%c0_6, %c0_7], %7 {strides = array<i32>} : memref<256x8xf32, #tpu.memory_space<vmem>>, vector<256x8xf32>,
    %c0_i32_8 = arith.constant 0 : i32
    %9 = arith.cmpi eq, %arg1, %c0_i32_8 : i32
    %10 = arith.extui %9 : i1 to i32
    %c0_i32_9 = arith.constant 0 : i32
    %11 = arith.cmpi ne, %10, %c0_i32_9 : i32
    scf.if %11 {
      %c0_10 = arith.constant 0 : index
      %c0_11 = arith.constant 0 : index
      %12 = vector.load %arg6[%c0_10, %c0_11] : memref<256x8xf32, #tpu.memory_space<vmem>>, vector<256x8xf32>
      %c0_12 = arith.constant 0 : index
      %c0_13 = arith.constant 0 : index
      %13 = vector.load %arg4[%c0_12, %c0_13] : memref<1x8xf32, #tpu.memory_space<vmem>>, vector<1x8xf32>
      %14 = vector.broadcast %13 : vector<1x8xf32> to vector<256x8xf32>
      %15 = arith.addf %12, %14 : vector<256x8xf32>
      %cst_14 = arith.constant 0.000000e+00 : f32
      %16 = vector.broadcast %cst_14 : f32 to vector<256x8xf32>
      %17 = arith.maximumf %15, %16 : vector<256x8xf32>
      %c0_15 = arith.constant 0 : index
      %c0_16 = arith.constant 0 : index
      %18 = vector.load %arg5[%c0_15, %c0_16] : memref<256x8xf32, #tpu.memory_space<vmem>>, vector<256x8xf32>
      tpu.vector_store %arg5[%c0_15, %c0_16], %17 {strides = array<i32>} : memref<256x8xf32, #tpu.memory_space<vmem>>, vector<256x8xf32>,
    } else {
    }
    return
  }
  func.func @transform_0(%arg0: i32, %arg1: i32) -> (i32, i32) {
    %c0_i32 = arith.constant 0 : i32
    return %arg0, %arg1 : i32, i32
  }
  func.func @transform_1(%arg0: i32, %arg1: i32) -> (i32, i32) {
    %c0_i32 = arith.constant 0 : i32
    %c0_i32_0 = arith.constant 0 : i32
    return %arg1, %c0_i32 : i32, i32
  }
  func.func @transform_2(%arg0: i32, %arg1: i32) -> (i32, i32) {
    %c0_i32 = arith.constant 0 : i32
    %c0_i32_0 = arith.constant 0 : i32
    %c0_i32_1 = arith.constant 0 : i32
    return %c0_i32, %c0_i32_0 : i32, i32
  }
  func.func @transform_3(%arg0: i32, %arg1: i32) -> (i32, i32) {
    %c0_i32 = arith.constant 0 : i32
    %c0_i32_0 = arith.constant 0 : i32
    return %arg0, %c0_i32 : i32, i32
  }
}

module attributes {stable_mosaic.version = 11 : i64} {
  func.func @_matmul_bias_relu_kernel(%arg0: i32, %arg1: i32, %arg2: memref<256x36xf32, #tpu.memory_space<vmem>>, %arg3: memref<36x4xf32, #tpu.memory_space<vmem>>, %arg4: memref<1x4xf32, #tpu.memory_space<vmem>>, %arg5: memref<256x4xf32, #tpu.memory_space<vmem>>, %arg6: memref<256x4xf32, #tpu.memory_space<vmem>>) attributes {dimension_semantics = [#tpu.dimension_semantics<parallel>, #tpu.dimension_semantics<arbitrary>], iteration_bounds = array<i64: 6, 1>, scalar_prefetch = 0 : i64, scratch_operands = 1 : i64, tpu.core_type = #tpu.core_type<tc>, window_params = [{transform_indices = @transform_0, window_bounds = array<i64: 256, 36>}, {transform_indices = @transform_1, window_bounds = array<i64: 36, 4>}, {pipeline_mode = #tpu.pipeline_mode<synchronous>, transform_indices = @transform_2, window_bounds = array<i64: 1, 4>}, {transform_indices = @transform_3, window_bounds = array<i64: 256, 4>}]} {
    %c0_i32 = arith.constant 0 : i32
    %0 = arith.cmpi eq, %arg1, %c0_i32 : i32
    %1 = arith.extui %0 : i1 to i32
    %c0_i32_0 = arith.constant 0 : i32
    %2 = arith.cmpi ne, %1, %c0_i32_0 : i32
    scf.if %2 {
      %cst_10 = arith.constant 0.000000e+00 : f32
      %12 = vector.broadcast %cst_10 : f32 to vector<256x4xf32>
      %c0_11 = arith.constant 0 : index
      %c0_12 = arith.constant 0 : index
      %13 = vector.load %arg6[%c0_11, %c0_12] : memref<256x4xf32, #tpu.memory_space<vmem>>, vector<256x4xf32>
      tpu.vector_store %arg6[%c0_11, %c0_12], %12 {strides = array<i32>} : memref<256x4xf32, #tpu.memory_space<vmem>>, vector<256x4xf32>,
    } else {
    }
    %c0 = arith.constant 0 : index
    %c0_1 = arith.constant 0 : index
    %3 = vector.load %arg6[%c0, %c0_1] : memref<256x4xf32, #tpu.memory_space<vmem>>, vector<256x4xf32>
    %c0_2 = arith.constant 0 : index
    %c0_3 = arith.constant 0 : index
    %4 = vector.load %arg2[%c0_2, %c0_3] : memref<256x36xf32, #tpu.memory_space<vmem>>, vector<256x36xf32>
    %c0_4 = arith.constant 0 : index
    %c0_5 = arith.constant 0 : index
    %5 = vector.load %arg3[%c0_4, %c0_5] : memref<36x4xf32, #tpu.memory_space<vmem>>, vector<36x4xf32>
    %cst = arith.constant dense<0.000000e+00> : vector<256x4xf32>
    %6 = tpu.matmul %4, %5, %cst {dimension_numbers = #tpu.dot_dimension_numbers<[1], [0], [0], [1], [0, 0, 1, 1], [], []>} : vector<256x36xf32>, vector<36x4xf32>, vector<256x4xf32> -> vector<256x4xf32>
    %7 = arith.addf %3, %6 : vector<256x4xf32>
    %c0_6 = arith.constant 0 : index
    %c0_7 = arith.constant 0 : index
    %8 = vector.load %arg6[%c0_6, %c0_7] : memref<256x4xf32, #tpu.memory_space<vmem>>, vector<256x4xf32>
    tpu.vector_store %arg6[%c0_6, %c0_7], %7 {strides = array<i32>} : memref<256x4xf32, #tpu.memory_space<vmem>>, vector<256x4xf32>,
    %c0_i32_8 = arith.constant 0 : i32
    %9 = arith.cmpi eq, %arg1, %c0_i32_8 : i32
    %10 = arith.extui %9 : i1 to i32
    %c0_i32_9 = arith.constant 0 : i32
    %11 = arith.cmpi ne, %10, %c0_i32_9 : i32
    scf.if %11 {
      %c0_10 = arith.constant 0 : index
      %c0_11 = arith.constant 0 : index
      %12 = vector.load %arg6[%c0_10, %c0_11] : memref<256x4xf32, #tpu.memory_space<vmem>>, vector<256x4xf32>
      %c0_12 = arith.constant 0 : index
      %c0_13 = arith.constant 0 : index
      %13 = vector.load %arg4[%c0_12, %c0_13] : memref<1x4xf32, #tpu.memory_space<vmem>>, vector<1x4xf32>
      %14 = vector.broadcast %13 : vector<1x4xf32> to vector<256x4xf32>
      %15 = arith.addf %12, %14 : vector<256x4xf32>
      %cst_14 = arith.constant 0.000000e+00 : f32
      %16 = vector.broadcast %cst_14 : f32 to vector<256x4xf32>
      %17 = arith.maximumf %15, %16 : vector<256x4xf32>
      %c0_15 = arith.constant 0 : index
      %c0_16 = arith.constant 0 : index
      %18 = vector.load %arg5[%c0_15, %c0_16] : memref<256x4xf32, #tpu.memory_space<vmem>>, vector<256x4xf32>
      tpu.vector_store %arg5[%c0_15, %c0_16], %17 {strides = array<i32>} : memref<256x4xf32, #tpu.memory_space<vmem>>, vector<256x4xf32>,
    } else {
    }
    return
  }
  func.func @transform_0(%arg0: i32, %arg1: i32) -> (i32, i32) {
    %c0_i32 = arith.constant 0 : i32
    return %arg0, %arg1 : i32, i32
  }
  func.func @transform_1(%arg0: i32, %arg1: i32) -> (i32, i32) {
    %c0_i32 = arith.constant 0 : i32
    %c0_i32_0 = arith.constant 0 : i32
    return %arg1, %c0_i32 : i32, i32
  }
  func.func @transform_2(%arg0: i32, %arg1: i32) -> (i32, i32) {
    %c0_i32 = arith.constant 0 : i32
    %c0_i32_0 = arith.constant 0 : i32
    %c0_i32_1 = arith.constant 0 : i32
    return %c0_i32, %c0_i32_0 : i32, i32
  }
  func.func @transform_3(%arg0: i32, %arg1: i32) -> (i32, i32) {
    %c0_i32 = arith.constant 0 : i32
    %c0_i32_0 = arith.constant 0 : i32
    return %arg0, %c0_i32 : i32, i32
  }
}

</mosaic_0001>

<bundles_post_ra>
// kernel: meta_faster_level.4
= control target key start
LH: loop header
LB: loop body
LE: loop exit
PB: predicated region body
PF: predicated region fallthrough
CT: control target
= control target key end

     0   :  { %s757_s15 = smov 0   ;;  %s759_s16 = smov 0   ;;  %s817_s0 = inlined_call_operand.vmem [shape: f32[2,3,1,1024], index: 0, kind: input, shape index: {}]   ;;  %s818_s1 = inlined_call_operand.vmem [shape: f32[3,2,1,1024], index: 1, kind: input, shape index: {}]   ;;  %s819_s2 = inlined_call_operand.vmem [shape: f32[2,3,1,1024], index: 2, kind: output, shape index: {0}]   ;;  %s820_s3 = inlined_call_operand.vmem [shape: f32[2,3,1,1024], index: 3, kind: output, shape index: {1}]   ;;  %s821_s4 = inlined_call_operand.vmem [shape: f32[2,3,2,1,1024], index: 4, kind: output, shape index: {2}]  }
   0x1   :  { %s761_s17 = smov 0   ;;  %s763_s18 = smov 0  }
   0x2   :  { %s765_s19 = smov 0  }
   0x3 LB: > { %s30_s20 = sadd.s32 1, %s722_s17  ;;  %s34_s21 = sadd.s32 1, %s726_s18  ;;  %s730_s19 = sphi %s765_s19, %s15_s19   ;;  %s726_s18 = sphi %s763_s18, %s825_s18   ;;  %s722_s17 = sphi %s761_s17, %s824_s17   ;;  %s718_s16 = sphi %s759_s16, %s823_s16   ;;  %s714_s15 = sphi %s757_s15, %s822_s15  }
   0x4   : > { %p32_p0 = scmp.ge.s32.totalorder %s30_s20, 3  ;;  %p640_p1 = scmp.ge.s32.totalorder %s730_s19, 1 }
   0x5   : > { %p230_p2 = scmp.lt.s32.totalorder %s730_s19, 7 }
   0x6   : > { %s827_s20 = smov (%p32_p0, %s30_s20), 0  ;;  %s829_s21 = smov (!%p32_p0, %s34_s21), %s726_s18 }
   0x7   : > { %p231_p3 = pnand %p640_p1, %p230_p2  ;;  %p36_p4 = scmp.ge.s32.totalorder %s829_s21, 2 }
   0x8   : > { %p306_p5 = scmp.lt.s32.totalorder (!%p231_p3), %s718_s16, 1  ;;  %p308_p6 = scmp.lt.s32.totalorder (!%p231_p3), %s714_s15, 2 }
   0x9   : > { %s831_s21 = smov (%p36_p4, %s829_s21), 0  ;;  %234 = sbr.rel (%p231_p3) target bundleno = 25 (0x19), region = 28 }
   0xe   : > { %s833_s16 = smov (!%p306_p5, %s718_s16), 1  ;;  %s835_s15 = smov (!%p308_p6, %s714_s15), 2 }
   0xf   : > { %s650_s22 = smul.u32 24, %s833_s16  ;;  %s642_s23 = sshll.u32 %s833_s16, 3 }
  0x10   : > { %s641_s24 = sshll.u32 %s835_s15, 3  ;;  %s643_s25 = sshll.u32 %s835_s15, 4 }
  0x11   : > { %s316_s26 = sadd.s32 %s650_s22, %s641_s24  ;;  %s328_s27 = sadd.s32 %s643_s25, %s642_s23 }
  0x12   : > { %s317_s30 = scalar_lea.vmem %s817_s0, %s316_s26  ;;  %s329_s7 = scalar_lea.vmem %s818_s1, %s328_s27 }
  0x13   : > { %s341_s10 = scalar_lea.vmem %s819_s2, %s316_s26  ;;  %v366_v0 = vld [vmem:[%s317_s30] sm:$0xff]  ;;  %s353_s13 = scalar_lea.vmem %s820_s3, %s316_s26 }
  0x14   : > { %v367_v1 = vld [vmem:[%s329_s7] sm:$0xff]  ;;  %s651_s14 = smul.u32 48, %s833_s16 }
  0x15   : > { %v368_v2 = vmul.f32 %v367_v1, %v366_v0  ;;  %v370_v3 = vsub.f32 %v366_v0, %v367_v1 }
  0x16   : > { %s364_s15 = sadd.s32 %s651_s14, %s643_s25 }
  0x17   : > { %369 = vst [vmem:[%s341_s10] sm:$0xff] %v368_v2  ;;  %371 = vst [vmem:[%s353_s13] sm:$0xff] %v370_v3  ;;  %s365_s24 = scalar_lea.vmem %s821_s4, %s364_s15 }
  0x18   : > { %372 = vst [vmem:[%s365_s24] sm:$0xff] %v366_v0  ;;  %647 = vst [vmem:[%s365_s24 + $0x8] sm:$0xff] %v367_v1 }
  0x19 PF: > { %s15_s19 = sadd.s32 1, %s730_s19   ;;  %s822_s15 = smov %s722_s17 }
  0x1a   : > { %p12_p7 = scmp.ge.s32.totalorder %s15_s19, 8   ;;  %s823_s16 = smov %s726_s18 }
  0x1b   : > { %s824_s17 = smov %s827_s20  ;;  %s825_s18 = smov %s831_s21 }
  0x1c   :  { %14 = sbr.rel (!%p12_p7) target bundleno = 3 (0x3), region = 86 }

// kernel: meta_faster_level.7
= control target key start
LH: loop header
LB: loop body
LE: loop exit
PB: predicated region body
PF: predicated region fallthrough
CT: control target
= control target key end

     0   :  { %s1177_s12 = smov 0   ;;  %s1179_s13 = smov 0   ;;  %s1490_s0 = inlined_call_operand.vmem [shape: f32[1536,72], index: 0, kind: input, shape index: {}]   ;;  %s1491_s1 = inlined_call_operand.vmem [shape: f32[72,8], index: 1, kind: input, shape index: {}]   ;;  %s1492_s2 = inlined_call_operand.vmem [shape: f32[1,8], index: 2, kind: input, shape index: {}]   ;;  %s1493_s3 = inlined_call_operand.vmem [shape: f32[1536,8], index: 3, kind: output, shape index: {}]  }
   0x1   :  { %s1181_s14 = smov 0  }
   0x2 LB: > { %s25_s15 = sadd.s32 1, %s1150_s13  ;;  %p942_p0 = scmp.ge.s32.totalorder %s1154_s14, 1  ;;  %s1154_s14 = sphi %s1181_s14, %s13_s14   ;;  %s1150_s13 = sphi %s1179_s13, %s1496_s13   ;;  %s1146_s12 = sphi %s1177_s12, %s1495_s12  }
   0x3   : > { %p27_p1 = scmp.ge.s32.totalorder %s25_s15, 6  ;;  %p166_p2 = scmp.lt.s32.totalorder %s1154_s14, 7 }
   0x5   : > { %s1498_s15 = smov (%p27_p1, %s25_s15), 0  ;;  %p167_p3 = pnand %p942_p0, %p166_p2 }
   0x6   : > { %s943_s20 = sshll.u32 (!%p167_p3), %s1146_s12, 5 }
   0x7   : > { %170 = sbr.rel (%p167_p3) target bundleno = 271 (0x10f), region = 32  ;;  %p1209_p4 = scmp.lt.s32.totalorder (!%p167_p3), %s943_s20, 191 }
   0xc   : > { %v328_v0 = vld [vmem:[%s1491_s1 + $0x40] sm:$0xff]  ;;  %v327_v1 = vld [vmem:[%s1491_s1 + $0x38] sm:$0xff]  ;;  %vm223_vm0 = vcmask 64512   ;;  %v326_v2 = vld [vmem:[%s1491_s1 + $0x30] sm:$0xff]  ;;  %v1156_v3 = vmov 0.0   ;;  %s1500_s20 = smov (!%p1209_p4, %s943_s20), 191 }
   0xd   : > { %1023 = vmatprep.subr.mxu0 %v328_v0  ;;  %1089 = vmatprep.subr.mxu1 %v328_v0  ;;  %225 = vst.msk [vmem:[#allocation2 + $0x8] sm:$0xff] %vm223_vm0, %v1156_v3  ;;  %224 = vst.msk [vmem:[#allocation2] sm:$0xff] %vm223_vm0, %v1156_v3  ;;  %v325_v4 = vld [vmem:[%s1491_s1 + $0x28] sm:$0xff]  ;;  %v324_v5 = vld [vmem:[%s1491_s1 + $0x20] sm:$0xff]  ;;  %s944_s5 = sshll.u32 %s1500_s20, 3  ;;  %vm329_vm1 = vcmask 588800  }
   0xe   : > { %1024 = vmatpush3.msra.mxu0 %v328_v0  ;;  %1098 = vmatpush3.msra.mxu1 %v328_v0  ;;  %226 = vst.msk [vmem:[#allocation2 + $0x10] sm:$0xff] %vm223_vm0, %v1156_v3  ;;  %227 = vst.msk [vmem:[#allocation2 + $0x18] sm:$0xff] %vm223_vm0, %v1156_v3  ;;  %v323_v6 = vld [vmem:[%s1491_s1 + $0x18] sm:$0xff]  ;;  %v322_v7 = vld [vmem:[%s1491_s1 + $0x10] sm:$0xff]  ;;  %s1272_s10 = scalar_lea.vmem %s1490_s0, %s944_s5  ;;  %s1363_s21 = scalar_lea.vmem %s1493_s3, %s944_s5 }
   0xf   : > { %228 = vst.msk [vmem:[#allocation2 + $0x20] sm:$0xff] %vm223_vm0, %v1156_v3  ;;  %229 = vst.msk [vmem:[#allocation2 + $0x28] sm:$0xff] %vm223_vm0, %v1156_v3  ;;  %1025 = vmatprep.subr.mxu0 %v327_v1  ;;  %1090 = vmatprep.subr.mxu1 %v327_v1  ;;  %v321_v8 = vld [vmem:[%s1491_s1 + $0x8] sm:$0xff]  ;;  %v320_v9 = vld [vmem:[%s1491_s1] sm:$0xff] }
  0x10   : > { %230 = vst.msk [vmem:[#allocation2 + $0x30] sm:$0xff] %vm223_vm0, %v1156_v3  ;;  %231 = vst.msk [vmem:[#allocation2 + $0x38] sm:$0xff] %vm223_vm0, %v1156_v3  ;;  %1026 = vmatpush3.msra.mxu0 %v327_v1  ;;  %1099 = vmatpush3.msra.mxu1 %v327_v1  ;;  %v288_v10 = vld [vmem:[%s1272_s10] sm:$0xff]  ;;  %v289_v12 = vld [vmem:[%s1272_s10 + $0x8] sm:$0xff] }
  0x11   : > { %232 = vst.msk [vmem:[#allocation2 + $0x40] sm:$0xff] %vm223_vm0, %v1156_v3  ;;  %233 = vst.msk [vmem:[#allocation2 + $0x48] sm:$0xff] %vm223_vm0, %v1156_v3  ;;  %1027 = vmatprep.subr.mxu0 %v326_v2  ;;  %1091 = vmatprep.subr.mxu1 %v326_v2  ;;  %v304_v11 = vld [vmem:[%s1272_s10 + $0x80] sm:$0xff]  ;;  %v305_v13 = vld [vmem:[%s1272_s10 + $0x88] sm:$0xff] }
  0x12   : > { %234 = vst.msk [vmem:[#allocation2 + $0x50] sm:$0xff] %vm223_vm0, %v1156_v3  ;;  %235 = vst.msk [vmem:[#allocation2 + $0x58] sm:$0xff] %vm223_vm0, %v1156_v3  ;;  %1028 = vmatpush3.msra.mxu0 %v326_v2  ;;  %1100 = vmatpush3.msra.mxu1 %v326_v2  ;;  %v290_v14 = vld [vmem:[%s1272_s10 + $0x10] sm:$0xff]  ;;  %v291_v16 = vld [vmem:[%s1272_s10 + $0x18] sm:$0xff] }
  0x13   : > { %236 = vst.msk [vmem:[#allocation2 + $0x60] sm:$0xff] %vm223_vm0, %v1156_v3  ;;  %237 = vst.msk [vmem:[#allocation2 + $0x68] sm:$0xff] %vm223_vm0, %v1156_v3  ;;  %1029 = vmatprep.subr.mxu0 %v325_v4  ;;  %1092 = vmatprep.subr.mxu1 %v325_v4  ;;  %v306_v15 = vld [vmem:[%s1272_s10 + $0x90] sm:$0xff]  ;;  %v307_v17 = vld [vmem:[%s1272_s10 + $0x98] sm:$0xff] }
  0x14   : > { %238 = vst.msk [vmem:[#allocation2 + $0x70] sm:$0xff] %vm223_vm0, %v1156_v3  ;;  %239 = vst.msk [vmem:[#allocation2 + $0x78] sm:$0xff] %vm223_vm0, %v1156_v3  ;;  %1030 = vmatpush3.msra.mxu0 %v325_v4  ;;  %1101 = vmatpush3.msra.mxu1 %v325_v4  ;;  %v292_v18 = vld [vmem:[%s1272_s10 + $0x20] sm:$0xff]  ;;  %v293_v20 = vld [vmem:[%s1272_s10 + $0x28] sm:$0xff] }
  0x15   : > { %240 = vst.msk [vmem:[#allocation2 + $0x80] sm:$0xff] %vm223_vm0, %v1156_v3  ;;  %241 = vst.msk [vmem:[#allocation2 + $0x88] sm:$0xff] %vm223_vm0, %v1156_v3  ;;  %1031 = vmatprep.subr.mxu0 %v324_v5  ;;  %1093 = vmatprep.subr.mxu1 %v324_v5  ;;  %v308_v19 = vld [vmem:[%s1272_s10 + $0xa0] sm:$0xff]  ;;  %v309_v21 = vld [vmem:[%s1272_s10 + $0xa8] sm:$0xff] }
  0x16   : > { %242 = vst.msk [vmem:[#allocation2 + $0x90] sm:$0xff] %vm223_vm0, %v1156_v3  ;;  %243 = vst.msk [vmem:[#allocation2 + $0x98] sm:$0xff] %vm223_vm0, %v1156_v3  ;;  %1032 = vmatpush3.msra.mxu0 %v324_v5  ;;  %1102 = vmatpush3.msra.mxu1 %v324_v5  ;;  %v294_v22 = vld [vmem:[%s1272_s10 + $0x30] sm:$0xff]  ;;  %v295_v24 = vld [vmem:[%s1272_s10 + $0x38] sm:$0xff] }
  0x17   : > { %244 = vst.msk [vmem:[#allocation2 + $0xa0] sm:$0xff] %vm223_vm0, %v1156_v3  ;;  %245 = vst.msk [vmem:[#allocation2 + $0xa8] sm:$0xff] %vm223_vm0, %v1156_v3  ;;  %1033 = vmatprep.subr.mxu0 %v323_v6  ;;  %1094 = vmatprep.subr.mxu1 %v323_v6  ;;  %v310_v23 = vld [vmem:[%s1272_s10 + $0xb0] sm:$0xff]  ;;  %v311_v25 = vld [vmem:[%s1272_s10 + $0xb8] sm:$0xff] }
  0x18   : > { %246 = vst.msk [vmem:[#allocation2 + $0xb0] sm:$0xff] %vm223_vm0, %v1156_v3  ;;  %247 = vst.msk [vmem:[#allocation2 + $0xb8] sm:$0xff] %vm223_vm0, %v1156_v3  ;;  %1034 = vmatpush3.msra.mxu0 %v323_v6  ;;  %1103 = vmatpush3.msra.mxu1 %v323_v6  ;;  %v296_v26 = vld [vmem:[%s1272_s10 + $0x40] sm:$0xff]  ;;  %v297_v28 = vld [vmem:[%s1272_s10 + $0x48] sm:$0xff] }
  0x19   : > { %248 = vst.msk [vmem:[#allocation2 + $0xc0] sm:$0xff] %vm223_vm0, %v1156_v3  ;;  %249 = vst.msk [vmem:[#allocation2 + $0xc8] sm:$0xff] %vm223_vm0, %v1156_v3  ;;  %1035 = vmatprep.subr.mxu0 %v322_v7  ;;  %1095 = vmatprep.subr.mxu1 %v322_v7  ;;  %v312_v27 = vld [vmem:[%s1272_s10 + $0xc0] sm:$0xff]  ;;  %v313_v29 = vld [vmem:[%s1272_s10 + $0xc8] sm:$0xff] }
  0x1a   : > { %250 = vst.msk [vmem:[#allocation2 + $0xd0] sm:$0xff] %vm223_vm0, %v1156_v3  ;;  %251 = vst.msk [vmem:[#allocation2 + $0xd8] sm:$0xff] %vm223_vm0, %v1156_v3  ;;  %1036 = vmatpush3.msra.mxu0 %v322_v7  ;;  %1104 = vmatpush3.msra.mxu1 %v322_v7  ;;  %v298_v30 = vld [vmem:[%s1272_s10 + $0x50] sm:$0xff]  ;;  %v299_v32 = vld [vmem:[%s1272_s10 + $0x58] sm:$0xff] }
  0x1b   : > { %252 = vst.msk [vmem:[#allocation2 + $0xe0] sm:$0xff] %vm223_vm0, %v1156_v3  ;;  %253 = vst.msk [vmem:[#allocation2 + $0xe8] sm:$0xff] %vm223_vm0, %v1156_v3  ;;  %1037 = vmatprep.subr.mxu0 %v321_v8  ;;  %1096 = vmatprep.subr.mxu1 %v321_v8  ;;  %v314_v31 = vld [vmem:[%s1272_s10 + $0xd0] sm:$0xff]  ;;  %v315_v33 = vld [vmem:[%s1272_s10 + $0xd8] sm:$0xff] }
  0x1c   : > { %254 = vst.msk [vmem:[#allocation2 + $0xf0] sm:$0xff] %vm223_vm0, %v1156_v3  ;;  %255 = vst.msk [vmem:[#allocation2 + $0xf8] sm:$0xff] %vm223_vm0, %v1156_v3  ;;  %1038 = vmatpush3.msra.mxu0 %v321_v8  ;;  %1105 = vmatpush3.msra.mxu1 %v321_v8  ;;  %v300_v34 = vld [vmem:[%s1272_s10 + $0x60] sm:$0xff]  ;;  %v301_v36 = vld [vmem:[%s1272_s10 + $0x68] sm:$0xff] }
  0x1d   : > { %1039 = vmatprep.subr.mxu0 %v320_v9  ;;  %1097 = vmatprep.subr.mxu1 %v320_v9  ;;  %v316_v35 = vld [vmem:[%s1272_s10 + $0xe0] sm:$0xff]  ;;  %v317_v37 = vld [vmem:[%s1272_s10 + $0xe8] sm:$0xff]  ;;  %v302_v38 = vld [vmem:[%s1272_s10 + $0x70] sm:$0xff] }
  0x1e   : > { %1040 = vmatpush3.msra.mxu0 %v320_v9  ;;  %1106 = vmatpush3.msra.mxu1 %v320_v9  ;;  %v318_v39 = vld [vmem:[%s1272_s10 + $0xf0] sm:$0xff]  ;;  %v303_v40 = vld [vmem:[%s1272_s10 + $0x78] sm:$0xff]  ;;  %v257_v42 = vld [vmem:[#allocation2 + $0x8] sm:$0xff] }
  0x1f   : > { %1041 = vmatprep.mubr.msk.f32.mxu0 %vm329_vm1, %v288_v10  ;;  %1065 = vmatprep.mubr.msk.f32.mxu1 %vm329_vm1, %v304_v11  ;;  %v319_v41 = vld [vmem:[%s1272_s10 + $0xf8] sm:$0xff]  ;;  %v273_v43 = vld [vmem:[#allocation2 + $0x88] sm:$0xff]  ;;  %v256_v46 = vld [vmem:[#allocation2] sm:$0xff] }
  0x20   : > { %1042 = vmatmul.mubr.msk.f32.vlgmr.msra.gmra.mxu0 %vm329_vm1, %v289_v12  ;;  %1066 = vmatmul.mubr.msk.f32.vlgmr.msra.gmra.mxu1 %vm329_vm1, %v305_v13  ;;  %v272_v47 = vld [vmem:[#allocation2 + $0x80] sm:$0xff]  ;;  %v259_v52 = vld [vmem:[#allocation2 + $0x18] sm:$0xff]  ;;  %v258_v58 = vld [vmem:[#allocation2 + $0x10] sm:$0xff] }
  0x21   : > { %1044 = vmatprep.mubr.msk.f32.mxu0 %vm329_vm1, %v290_v14  ;;  %1068 = vmatprep.mubr.msk.f32.mxu1 %vm329_vm1, %v306_v15  ;;  %v275_v53 = vld [vmem:[#allocation2 + $0x98] sm:$0xff]  ;;  %v274_v59 = vld [vmem:[#allocation2 + $0x90] sm:$0xff]  ;;  %v261_v0 = vld [vmem:[#allocation2 + $0x28] sm:$0xff] }
  0x22   : > { %v277_v1 = vld [vmem:[#allocation2 + $0xa8] sm:$0xff]  ;;  %v1350_v4 = vld [vmem:[%s1492_s2] ss:$0 sm:$0xff] }
  0x23   : > { %v260_v7 = vld [vmem:[#allocation2 + $0x20] sm:$0xff] }
  0x24   : > { %1045 = vmatmul.mubr.msk.f32.gmra.mxu0 %vm329_vm1, %v291_v16  ;;  %1069 = vmatmul.mubr.msk.f32.gmra.mxu1 %vm329_vm1, %v307_v17  ;;  %v276_v8 = vld [vmem:[#allocation2 + $0xa0] sm:$0xff] }
  0x25   : > { %1047 = vmatprep.mubr.msk.f32.mxu0 %vm329_vm1, %v292_v18  ;;  %1071 = vmatprep.mubr.msk.f32.mxu1 %vm329_vm1, %v308_v19  ;;  %v263_v19 = vld [vmem:[#allocation2 + $0x38] sm:$0xff] }
  0x28   : > { %1048 = vmatmul.mubr.msk.f32.gmra.mxu0 %vm329_vm1, %v293_v20  ;;  %1072 = vmatmul.mubr.msk.f32.gmra.mxu1 %vm329_vm1, %v309_v21  ;;  %v279_v20 = vld [vmem:[#allocation2 + $0xb8] sm:$0xff] }
  0x29   : > { %1050 = vmatprep.mubr.msk.f32.mxu0 %vm329_vm1, %v294_v22  ;;  %1074 = vmatprep.mubr.msk.f32.mxu1 %vm329_vm1, %v310_v23 }
  0x2c   : > { %1051 = vmatmul.mubr.msk.f32.gmra.mxu0 %vm329_vm1, %v295_v24  ;;  %1075 = vmatmul.mubr.msk.f32.gmra.mxu1 %vm329_vm1, %v311_v25 }
  0x2d   : > { %1053 = vmatprep.mubr.msk.f32.mxu0 %vm329_vm1, %v296_v26  ;;  %1077 = vmatprep.mubr.msk.f32.mxu1 %vm329_vm1, %v312_v27 }
  0x30   : > { %1054 = vmatmul.mubr.msk.f32.gmra.mxu0 %vm329_vm1, %v297_v28  ;;  %1078 = vmatmul.mubr.msk.f32.gmra.mxu1 %vm329_vm1, %v313_v29  ;;  %v262_v29 = vld [vmem:[#allocation2 + $0x30] sm:$0xff] }
  0x31   : > { %1056 = vmatprep.mubr.msk.f32.mxu0 %vm329_vm1, %v298_v30  ;;  %1080 = vmatprep.mubr.msk.f32.mxu1 %vm329_vm1, %v314_v31  ;;  %v278_v30 = vld [vmem:[#allocation2 + $0xb0] sm:$0xff] }
  0x34   : > { %1057 = vmatmul.mubr.msk.f32.gmra.mxu0 %vm329_vm1, %v299_v32  ;;  %1081 = vmatmul.mubr.msk.f32.gmra.mxu1 %vm329_vm1, %v315_v33 }
  0x35   : > { %1059 = vmatprep.mubr.msk.f32.mxu0 %vm329_vm1, %v300_v34  ;;  %1083 = vmatprep.mubr.msk.f32.mxu1 %vm329_vm1, %v316_v35 }
  0x38   : > { %1060 = vmatmul.mubr.msk.f32.gmra.mxu0 %vm329_vm1, %v301_v36  ;;  %1084 = vmatmul.mubr.msk.f32.gmra.mxu1 %vm329_vm1, %v317_v37 }
  0x39   : > { %1062 = vmatprep.mubr.msk.f32.mxu0 %vm329_vm1, %v302_v38  ;;  %1086 = vmatprep.mubr.msk.f32.mxu1 %vm329_vm1, %v318_v39 }
  0x3c   : > { %1063 = vmatmul.mubr.msk.f32.gmra.mxu0 %vm329_vm1, %v303_v40  ;;  %1087 = vmatmul.mubr.msk.f32.gmra.mxu1 %vm329_vm1, %v319_v41  ;;  %v265_v41 = vld [vmem:[#allocation2 + $0x48] sm:$0xff] }
  0xe0   : > { %v1043_v44 = vpop.f32.mrf.mxu0  ;;  %v1067_v45 = vpop.f32.mrf.mxu1 }
  0xe1   : > { %v652_v48 = vadd.f32 %v1043_v44, %v257_v42  ;;  %v668_v49 = vadd.f32 %v1067_v45, %v273_v43  ;;  %v281_v42 = vld [vmem:[#allocation2 + $0xc8] sm:$0xff] }
  0xe2   : > { %v492_v50 = vpop.f32.mrf.mxu0  ;;  %v572_v51 = vpop.f32.mrf.mxu1 }
  0xe3   : > { %685 = vst.msk [vmem:[#allocation2 + $0x8] sm:$0xff] %vm223_vm0, %v652_v48  ;;  %701 = vst.msk [vmem:[#allocation2 + $0x88] sm:$0xff] %vm223_vm0, %v668_v49  ;;  %v651_v54 = vadd.f32 %v492_v50, %v256_v46  ;;  %v667_v55 = vadd.f32 %v572_v51, %v272_v47 }
  0xe4   : > { %v1046_v56 = vpop.f32.mrf.mxu0  ;;  %v1070_v57 = vpop.f32.mrf.mxu1 }
  0xe5   : > { %684 = vst.msk [vmem:[#allocation2] sm:$0xff] %vm223_vm0, %v651_v54  ;;  %700 = vst.msk [vmem:[#allocation2 + $0x80] sm:$0xff] %vm223_vm0, %v667_v55  ;;  %v654_v60 = vadd.f32 %v1046_v56, %v259_v52  ;;  %v670_v61 = vadd.f32 %v1070_v57, %v275_v53  ;;  %v264_v53 = vld [vmem:[#allocation2 + $0x40] sm:$0xff] }
  0xe6   : > { %v502_v62 = vpop.f32.mrf.mxu0  ;;  %v582_v63 = vpop.f32.mrf.mxu1  ;;  %v280_v54 = vld [vmem:[#allocation2 + $0xc0] sm:$0xff] }
  0xe7   : > { %687 = vst.msk [vmem:[#allocation2 + $0x18] sm:$0xff] %vm223_vm0, %v654_v60  ;;  %703 = vst.msk [vmem:[#allocation2 + $0x98] sm:$0xff] %vm223_vm0, %v670_v61  ;;  %v653_v2 = vadd.f32 %v502_v62, %v258_v58  ;;  %v669_v3 = vadd.f32 %v582_v63, %v274_v59 }
  0xe8   : > { %v1049_v5 = vpop.f32.mrf.mxu0  ;;  %v1073_v6 = vpop.f32.mrf.mxu1 }
  0xe9   : > { %686 = vst.msk [vmem:[#allocation2 + $0x10] sm:$0xff] %vm223_vm0, %v653_v2  ;;  %702 = vst.msk [vmem:[#allocation2 + $0x90] sm:$0xff] %vm223_vm0, %v669_v3  ;;  %v656_v9 = vadd.f32 %v1049_v5, %v261_v0  ;;  %v672_v10 = vadd.f32 %v1073_v6, %v277_v1  ;;  %v267_v1 = vld [vmem:[#allocation2 + $0x58] sm:$0xff]  ;;  %v266_v3 = vld [vmem:[#allocation2 + $0x50] sm:$0xff] }
  0xea   : > { %v720_v11 = vld [vmem:[#allocation2 + $0x8] sm:$0xff]  ;;  %v512_v13 = vpop.f32.mrf.mxu0  ;;  %v592_v14 = vpop.f32.mrf.mxu1  ;;  %v283_v2 = vld [vmem:[#allocation2 + $0xd8] sm:$0xff] }
  0xeb   : > { %v736_v12 = vld [vmem:[#allocation2 + $0x88] sm:$0xff]  ;;  %v759_v15 = vadd.f32 %v1350_v4, %v720_v11  ;;  %689 = vst.msk [vmem:[#allocation2 + $0x28] sm:$0xff] %vm223_vm0, %v656_v9  ;;  %705 = vst.msk [vmem:[#allocation2 + $0xa8] sm:$0xff] %vm223_vm0, %v672_v10  ;;  %v655_v17 = vadd.f32 %v512_v13, %v260_v7  ;;  %v671_v18 = vadd.f32 %v592_v14, %v276_v8  ;;  %v282_v11 = vld [vmem:[#allocation2 + $0xd0] sm:$0xff] }
  0xec   : > { %v775_v16 = vadd.f32 %v1350_v4, %v736_v12  ;;  %v719_v21 = vld [vmem:[#allocation2] sm:$0xff]  ;;  %v1052_v23 = vpop.f32.mrf.mxu0  ;;  %v1076_v24 = vpop.f32.mrf.mxu1 }
  0xed   : > { %v735_v22 = vld [vmem:[#allocation2 + $0x80] sm:$0xff]  ;;  %v791_v25 = vmax.f32 %v759_v15, 0.0  ;;  %v758_v27 = vadd.f32 %v1350_v4, %v719_v21  ;;  %688 = vst.msk [vmem:[#allocation2 + $0x20] sm:$0xff] %vm223_vm0, %v655_v17  ;;  %704 = vst.msk [vmem:[#allocation2 + $0xa0] sm:$0xff] %vm223_vm0, %v671_v18  ;;  %v658_v33 = vadd.f32 %v1052_v23, %v263_v19  ;;  %v674_v34 = vadd.f32 %v1076_v24, %v279_v20  ;;  %v269_v20 = vld [vmem:[#allocation2 + $0x68] sm:$0xff] }
  0xee   : > { %v807_v26 = vmax.f32 %v775_v16, 0.0  ;;  %v774_v28 = vadd.f32 %v1350_v4, %v735_v22  ;;  %v722_v31 = vld [vmem:[#allocation2 + $0x18] sm:$0xff]  ;;  %v522_v35 = vpop.f32.mrf.mxu0  ;;  %v602_v36 = vpop.f32.mrf.mxu1  ;;  %v285_v21 = vld [vmem:[#allocation2 + $0xe8] sm:$0xff] }
  0xef   : > { %v738_v32 = vld [vmem:[#allocation2 + $0x98] sm:$0xff]  ;;  %823 = vst.msk [vmem:[%s1363_s21 + $0x8] sm:$0xff] %vm223_vm0, %v791_v25  ;;  %v790_v37 = vmax.f32 %v758_v27, 0.0  ;;  %v761_v39 = vadd.f32 %v1350_v4, %v722_v31  ;;  %691 = vst.msk [vmem:[#allocation2 + $0x38] sm:$0xff] %vm223_vm0, %v658_v33  ;;  %v657_v45 = vadd.f32 %v522_v35, %v262_v29  ;;  %v673_v46 = vadd.f32 %v602_v36, %v278_v30  ;;  %v284_v33 = vld [vmem:[#allocation2 + $0xe0] sm:$0xff] }
  0xf0   : > { %839 = vst.msk [vmem:[%s1363_s21 + $0x88] sm:$0xff] %vm223_vm0, %v807_v26  ;;  %v806_v38 = vmax.f32 %v774_v28, 0.0  ;;  %v777_v40 = vadd.f32 %v1350_v4, %v738_v32  ;;  %v721_v43 = vld [vmem:[#allocation2 + $0x10] sm:$0xff]  ;;  %707 = vst.msk [vmem:[#allocation2 + $0xb8] sm:$0xff] %vm223_vm0, %v674_v34  ;;  %v1055_v47 = vpop.f32.mrf.mxu0  ;;  %v1079_v48 = vpop.f32.mrf.mxu1  ;;  %v268_v32 = vld [vmem:[#allocation2 + $0x60] sm:$0xff] }
  0xf1   : > { %v737_v44 = vld [vmem:[#allocation2 + $0x90] sm:$0xff]  ;;  %822 = vst.msk [vmem:[%s1363_s21] sm:$0xff] %vm223_vm0, %v790_v37  ;;  %v793_v49 = vmax.f32 %v761_v39, 0.0  ;;  %v760_v51 = vadd.f32 %v1350_v4, %v721_v43  ;;  %690 = vst.msk [vmem:[#allocation2 + $0x30] sm:$0xff] %vm223_vm0, %v657_v45  ;;  %v660_v57 = vadd.f32 %v1055_v47, %v265_v41  ;;  %v676_v58 = vadd.f32 %v1079_v48, %v281_v42  ;;  %v287_v45 = vld [vmem:[#allocation2 + $0xf8] sm:$0xff] }
  0xf2   : > { %838 = vst.msk [vmem:[%s1363_s21 + $0x80] sm:$0xff] %vm223_vm0, %v806_v38  ;;  %v809_v50 = vmax.f32 %v777_v40, 0.0  ;;  %v776_v52 = vadd.f32 %v1350_v4, %v737_v44  ;;  %v724_v55 = vld [vmem:[#allocation2 + $0x28] sm:$0xff]  ;;  %706 = vst.msk [vmem:[#allocation2 + $0xb0] sm:$0xff] %vm223_vm0, %v673_v46  ;;  %v532_v59 = vpop.f32.mrf.mxu0  ;;  %v612_v60 = vpop.f32.mrf.mxu1  ;;  %v271_v44 = vld [vmem:[#allocation2 + $0x78] sm:$0xff] }
  0xf3   : > { %v740_v56 = vld [vmem:[#allocation2 + $0xa8] sm:$0xff]  ;;  %825 = vst.msk [vmem:[%s1363_s21 + $0x18] sm:$0xff] %vm223_vm0, %v793_v49  ;;  %v792_v61 = vmax.f32 %v760_v51, 0.0  ;;  %v763_v63 = vadd.f32 %v1350_v4, %v724_v55  ;;  %693 = vst.msk [vmem:[#allocation2 + $0x48] sm:$0xff] %vm223_vm0, %v660_v57  ;;  %v659_v7 = vadd.f32 %v532_v59, %v264_v53  ;;  %v675_v8 = vadd.f32 %v612_v60, %v280_v54  ;;  %v286_v57 = vld [vmem:[#allocation2 + $0xf0] sm:$0xff] }
  0xf4   : > { %841 = vst.msk [vmem:[%s1363_s21 + $0x98] sm:$0xff] %vm223_vm0, %v809_v50  ;;  %v808_v62 = vmax.f32 %v776_v52, 0.0  ;;  %v779_v0 = vadd.f32 %v1350_v4, %v740_v56  ;;  %v723_v5 = vld [vmem:[#allocation2 + $0x20] sm:$0xff]  ;;  %709 = vst.msk [vmem:[#allocation2 + $0xc8] sm:$0xff] %vm223_vm0, %v676_v58  ;;  %v1058_v9 = vpop.f32.mrf.mxu0  ;;  %v1082_v10 = vpop.f32.mrf.mxu1  ;;  %v270_v56 = vld [vmem:[#allocation2 + $0x70] sm:$0xff] }
  0xf5   : > { %v739_v6 = vld [vmem:[#allocation2 + $0xa0] sm:$0xff]  ;;  %824 = vst.msk [vmem:[%s1363_s21 + $0x10] sm:$0xff] %vm223_vm0, %v792_v61  ;;  %v795_v12 = vmax.f32 %v763_v63, 0.0  ;;  %v762_v14 = vadd.f32 %v1350_v4, %v723_v5  ;;  %692 = vst.msk [vmem:[#allocation2 + $0x40] sm:$0xff] %vm223_vm0, %v659_v7  ;;  %v662_v16 = vadd.f32 %v1058_v9, %v267_v1  ;;  %v678_v17 = vadd.f32 %v1082_v10, %v283_v2 }
  0xf6   : > { %840 = vst.msk [vmem:[%s1363_s21 + $0x90] sm:$0xff] %vm223_vm0, %v808_v62  ;;  %v811_v13 = vmax.f32 %v779_v0, 0.0  ;;  %v778_v15 = vadd.f32 %v1350_v4, %v739_v6  ;;  %708 = vst.msk [vmem:[#allocation2 + $0xc0] sm:$0xff] %vm223_vm0, %v675_v8  ;;  %v542_v18 = vpop.f32.mrf.mxu0  ;;  %v622_v19 = vpop.f32.mrf.mxu1  ;;  %v726_v24 = vld [vmem:[#allocation2 + $0x38] sm:$0xff] }
  0xf7   : > { %827 = vst.msk [vmem:[%s1363_s21 + $0x28] sm:$0xff] %vm223_vm0, %v795_v12  ;;  %v794_v22 = vmax.f32 %v762_v14, 0.0  ;;  %v742_v25 = vld [vmem:[#allocation2 + $0xb8] sm:$0xff]  ;;  %v661_v26 = vadd.f32 %v542_v18, %v266_v3  ;;  %v677_v27 = vadd.f32 %v622_v19, %v282_v11  ;;  %v765_v28 = vadd.f32 %v1350_v4, %v726_v24  ;;  %695 = vst.msk [vmem:[#allocation2 + $0x58] sm:$0xff] %vm223_vm0, %v662_v16 }
  0xf8   : > { %843 = vst.msk [vmem:[%s1363_s21 + $0xa8] sm:$0xff] %vm223_vm0, %v811_v13  ;;  %v810_v23 = vmax.f32 %v778_v15, 0.0  ;;  %v781_v29 = vadd.f32 %v1350_v4, %v742_v25  ;;  %711 = vst.msk [vmem:[#allocation2 + $0xd8] sm:$0xff] %vm223_vm0, %v678_v17  ;;  %v1061_v30 = vpop.f32.mrf.mxu0  ;;  %v1085_v31 = vpop.f32.mrf.mxu1  ;;  %v725_v34 = vld [vmem:[#allocation2 + $0x30] sm:$0xff] }
  0xf9   : > { %826 = vst.msk [vmem:[%s1363_s21 + $0x20] sm:$0xff] %vm223_vm0, %v794_v22  ;;  %v741_v35 = vld [vmem:[#allocation2 + $0xb0] sm:$0xff]  ;;  %694 = vst.msk [vmem:[#allocation2 + $0x50] sm:$0xff] %vm223_vm0, %v661_v26  ;;  %v664_v36 = vadd.f32 %v1061_v30, %v269_v20  ;;  %v680_v37 = vadd.f32 %v1085_v31, %v285_v21  ;;  %v797_v38 = vmax.f32 %v765_v28, 0.0  ;;  %v764_v40 = vadd.f32 %v1350_v4, %v725_v34 }
  0xfa   : > { %842 = vst.msk [vmem:[%s1363_s21 + $0xa0] sm:$0xff] %vm223_vm0, %v810_v23  ;;  %710 = vst.msk [vmem:[#allocation2 + $0xd0] sm:$0xff] %vm223_vm0, %v677_v27  ;;  %v813_v39 = vmax.f32 %v781_v29, 0.0  ;;  %v780_v41 = vadd.f32 %v1350_v4, %v741_v35  ;;  %v552_v42 = vpop.f32.mrf.mxu0  ;;  %v632_v43 = vpop.f32.mrf.mxu1  ;;  %v728_v46 = vld [vmem:[#allocation2 + $0x48] sm:$0xff] }
  0xfb   : > { %v744_v47 = vld [vmem:[#allocation2 + $0xc8] sm:$0xff]  ;;  %697 = vst.msk [vmem:[#allocation2 + $0x68] sm:$0xff] %vm223_vm0, %v664_v36  ;;  %713 = vst.msk [vmem:[#allocation2 + $0xe8] sm:$0xff] %vm223_vm0, %v680_v37  ;;  %v663_v48 = vadd.f32 %v552_v42, %v268_v32  ;;  %v679_v49 = vadd.f32 %v632_v43, %v284_v33  ;;  %v796_v50 = vmax.f32 %v764_v40, 0.0  ;;  %v767_v52 = vadd.f32 %v1350_v4, %v728_v46 }
  0xfc   : > { %829 = vst.msk [vmem:[%s1363_s21 + $0x38] sm:$0xff] %vm223_vm0, %v797_v38  ;;  %845 = vst.msk [vmem:[%s1363_s21 + $0xb8] sm:$0xff] %vm223_vm0, %v813_v39  ;;  %v812_v51 = vmax.f32 %v780_v41, 0.0  ;;  %v783_v53 = vadd.f32 %v1350_v4, %v744_v47  ;;  %v1064_v54 = vpop.f32.mrf.mxu0  ;;  %v1088_v55 = vpop.f32.mrf.mxu1  ;;  %v727_v58 = vld [vmem:[#allocation2 + $0x40] sm:$0xff] }
  0xfd   : > { %v743_v59 = vld [vmem:[#allocation2 + $0xc0] sm:$0xff]  ;;  %696 = vst.msk [vmem:[#allocation2 + $0x60] sm:$0xff] %vm223_vm0, %v663_v48  ;;  %712 = vst.msk [vmem:[#allocation2 + $0xe0] sm:$0xff] %vm223_vm0, %v679_v49  ;;  %v666_v60 = vadd.f32 %v1064_v54, %v271_v44  ;;  %v682_v61 = vadd.f32 %v1088_v55, %v287_v45  ;;  %v799_v62 = vmax.f32 %v767_v52, 0.0  ;;  %v766_v0 = vadd.f32 %v1350_v4, %v727_v58 }
  0xfe   : > { %828 = vst.msk [vmem:[%s1363_s21 + $0x30] sm:$0xff] %vm223_vm0, %v796_v50  ;;  %844 = vst.msk [vmem:[%s1363_s21 + $0xb0] sm:$0xff] %vm223_vm0, %v812_v51  ;;  %v815_v63 = vmax.f32 %v783_v53, 0.0  ;;  %v782_v1 = vadd.f32 %v1350_v4, %v743_v59  ;;  %v562_v2 = vpop.f32.mrf.mxu0  ;;  %v642_v3 = vpop.f32.mrf.mxu1  ;;  %v730_v5 = vld [vmem:[#allocation2 + $0x58] sm:$0xff] }
  0xff   : > { %v746_v6 = vld [vmem:[#allocation2 + $0xd8] sm:$0xff]  ;;  %699 = vst.msk [vmem:[#allocation2 + $0x78] sm:$0xff] %vm223_vm0, %v666_v60  ;;  %715 = vst.msk [vmem:[#allocation2 + $0xf8] sm:$0xff] %vm223_vm0, %v682_v61  ;;  %v665_v7 = vadd.f32 %v562_v2, %v270_v56  ;;  %v681_v8 = vadd.f32 %v642_v3, %v286_v57  ;;  %v798_v9 = vmax.f32 %v766_v0, 0.0  ;;  %v769_v11 = vadd.f32 %v1350_v4, %v730_v5 }
 0x100   : > { %831 = vst.msk [vmem:[%s1363_s21 + $0x48] sm:$0xff] %vm223_vm0, %v799_v62  ;;  %847 = vst.msk [vmem:[%s1363_s21 + $0xc8] sm:$0xff] %vm223_vm0, %v815_v63  ;;  %v814_v10 = vmax.f32 %v782_v1, 0.0  ;;  %v785_v12 = vadd.f32 %v1350_v4, %v746_v6  ;;  %v729_v13 = vld [vmem:[#allocation2 + $0x50] sm:$0xff] }
 0x101   : > { %v745_v14 = vld [vmem:[#allocation2 + $0xd0] sm:$0xff]  ;;  %v768_v15 = vadd.f32 %v1350_v4, %v729_v13  ;;  %698 = vst.msk [vmem:[#allocation2 + $0x70] sm:$0xff] %vm223_vm0, %v665_v7  ;;  %714 = vst.msk [vmem:[#allocation2 + $0xf0] sm:$0xff] %vm223_vm0, %v681_v8  ;;  %v801_v17 = vmax.f32 %v769_v11, 0.0 }
 0x102   : > { %v784_v16 = vadd.f32 %v1350_v4, %v745_v14  ;;  %830 = vst.msk [vmem:[%s1363_s21 + $0x40] sm:$0xff] %vm223_vm0, %v798_v9  ;;  %846 = vst.msk [vmem:[%s1363_s21 + $0xc0] sm:$0xff] %vm223_vm0, %v814_v10  ;;  %v817_v18 = vmax.f32 %v785_v12, 0.0  ;;  %v732_v19 = vld [vmem:[#allocation2 + $0x68] sm:$0xff] }
 0x103   : > { %v748_v20 = vld [vmem:[#allocation2 + $0xe8] sm:$0xff]  ;;  %v800_v21 = vmax.f32 %v768_v15, 0.0  ;;  %v771_v23 = vadd.f32 %v1350_v4, %v732_v19  ;;  %833 = vst.msk [vmem:[%s1363_s21 + $0x58] sm:$0xff] %vm223_vm0, %v801_v17 }
 0x104   : > { %v816_v22 = vmax.f32 %v784_v16, 0.0  ;;  %v787_v24 = vadd.f32 %v1350_v4, %v748_v20  ;;  %849 = vst.msk [vmem:[%s1363_s21 + $0xd8] sm:$0xff] %vm223_vm0, %v817_v18  ;;  %v731_v25 = vld [vmem:[#allocation2 + $0x60] sm:$0xff] }
 0x105   : > { %v747_v26 = vld [vmem:[#allocation2 + $0xe0] sm:$0xff]  ;;  %832 = vst.msk [vmem:[%s1363_s21 + $0x50] sm:$0xff] %vm223_vm0, %v800_v21  ;;  %v803_v27 = vmax.f32 %v771_v23, 0.0  ;;  %v770_v29 = vadd.f32 %v1350_v4, %v731_v25 }
 0x106   : > { %848 = vst.msk [vmem:[%s1363_s21 + $0xd0] sm:$0xff] %vm223_vm0, %v816_v22  ;;  %v819_v28 = vmax.f32 %v787_v24, 0.0  ;;  %v786_v30 = vadd.f32 %v1350_v4, %v747_v26  ;;  %v734_v31 = vld [vmem:[#allocation2 + $0x78] sm:$0xff] }
 0x107   : > { %v750_v32 = vld [vmem:[#allocation2 + $0xf8] sm:$0xff]  ;;  %835 = vst.msk [vmem:[%s1363_s21 + $0x68] sm:$0xff] %vm223_vm0, %v803_v27  ;;  %v802_v33 = vmax.f32 %v770_v29, 0.0  ;;  %v773_v35 = vadd.f32 %v1350_v4, %v734_v31 }
 0x108   : > { %851 = vst.msk [vmem:[%s1363_s21 + $0xe8] sm:$0xff] %vm223_vm0, %v819_v28  ;;  %v818_v34 = vmax.f32 %v786_v30, 0.0  ;;  %v789_v36 = vadd.f32 %v1350_v4, %v750_v32  ;;  %v733_v37 = vld [vmem:[#allocation2 + $0x70] sm:$0xff] }
 0x109   : > { %v749_v38 = vld [vmem:[#allocation2 + $0xf0] sm:$0xff]  ;;  %834 = vst.msk [vmem:[%s1363_s21 + $0x60] sm:$0xff] %vm223_vm0, %v802_v33  ;;  %v805_v39 = vmax.f32 %v773_v35, 0.0  ;;  %v772_v41 = vadd.f32 %v1350_v4, %v733_v37 }
 0x10a   : > { %850 = vst.msk [vmem:[%s1363_s21 + $0xe0] sm:$0xff] %vm223_vm0, %v818_v34  ;;  %v821_v40 = vmax.f32 %v789_v36, 0.0  ;;  %v788_v42 = vadd.f32 %v1350_v4, %v749_v38 }
 0x10b   : > { %837 = vst.msk [vmem:[%s1363_s21 + $0x78] sm:$0xff] %vm223_vm0, %v805_v39  ;;  %v804_v43 = vmax.f32 %v772_v41, 0.0 }
 0x10c   : > { %853 = vst.msk [vmem:[%s1363_s21 + $0xf8] sm:$0xff] %vm223_vm0, %v821_v40  ;;  %v820_v44 = vmax.f32 %v788_v42, 0.0 }
 0x10d   : > { %836 = vst.msk [vmem:[%s1363_s21 + $0x70] sm:$0xff] %vm223_vm0, %v804_v43 }
 0x10e   : > { %852 = vst.msk [vmem:[%s1363_s21 + $0xf0] sm:$0xff] %vm223_vm0, %v820_v44 }
 0x10f PF: > { %s13_s14 = sadd.s32 1, %s1154_s14   ;;  %s1495_s12 = smov %s1150_s13 }
 0x110   : > { %p10_p5 = scmp.ge.s32.totalorder %s13_s14, 8   ;;  %s1496_s13 = smov %s1498_s15 }
 0x112   :  { %12 = sbr.rel (!%p10_p5) target bundleno = 2 (0x2), region = 73 }

// kernel: meta_faster_level.5
= control target key start
LH: loop header
LB: loop body
LE: loop exit
PB: predicated region body
PF: predicated region fallthrough
CT: control target
= control target key end

     0   :  { %s1158_s12 = smov 0   ;;  %s1160_s13 = smov 0   ;;  %s1459_s0 = inlined_call_operand.vmem [shape: f32[1536,36], index: 0, kind: input, shape index: {}]   ;;  %s1460_s1 = inlined_call_operand.vmem [shape: f32[36,4], index: 1, kind: input, shape index: {}]   ;;  %s1461_s2 = inlined_call_operand.vmem [shape: f32[1,4], index: 2, kind: input, shape index: {}]   ;;  %s1462_s3 = inlined_call_operand.vmem [shape: f32[1536,4], index: 3, kind: output, shape index: {}]  }
   0x1   :  { %s1162_s14 = smov 0  }
   0x2 LB: > { %s25_s15 = sadd.s32 1, %s1131_s13  ;;  %p942_p0 = scmp.ge.s32.totalorder %s1135_s14, 1  ;;  %s1135_s14 = sphi %s1162_s14, %s13_s14   ;;  %s1131_s13 = sphi %s1160_s13, %s1465_s13   ;;  %s1127_s12 = sphi %s1158_s12, %s1464_s12  }
   0x3   : > { %p27_p1 = scmp.ge.s32.totalorder %s25_s15, 6  ;;  %p166_p2 = scmp.lt.s32.totalorder %s1135_s14, 7 }
   0x5   : > { %s1467_s15 = smov (%p27_p1, %s25_s15), 0  ;;  %p167_p3 = pnand %p942_p0, %p166_p2 }
   0x6   : > { %s943_s20 = sshll.u32 (!%p167_p3), %s1127_s12, 5 }
   0x7   : > { %170 = sbr.rel (%p167_p3) target bundleno = 263 (0x107), region = 32  ;;  %p1187_p4 = scmp.lt.s32.totalorder (!%p167_p3), %s943_s20, 191 }
   0xc   : > { %v324_v0 = vld [vmem:[%s1460_s1 + $0x20] sm:$0xf]  ;;  %vm422_vm0 = vcmask 1043456   ;;  %v323_v1 = vld [vmem:[%s1460_s1 + $0x18] sm:$0xff]  ;;  %vm223_vm1 = vcmask 31744   ;;  %v322_v2 = vld [vmem:[%s1460_s1 + $0x10] sm:$0xff] }
   0xd   : > { %1020 = vmatprep.subr.msk.mxu0 %vm422_vm0, %v324_v0  ;;  %1078 = vmatprep.subr.msk.mxu1 %vm422_vm0, %v324_v0  ;;  %v1137_v3 = vmov 0.0   ;;  %s1469_s20 = smov (!%p1187_p4, %s943_s20), 191  ;;  %v321_v4 = vld [vmem:[%s1460_s1 + $0x8] sm:$0xff]  ;;  %v320_v5 = vld [vmem:[%s1460_s1] sm:$0xff]  ;;  %vm325_vm2 = vcmask 293888  }
   0xe   : > { %1021 = vmatpush3.msk.msra.mxu0 %vm422_vm0, %v324_v0  ;;  %1083 = vmatpush3.msk.msra.mxu1 %vm422_vm0, %v324_v0  ;;  %225 = vst.msk [vmem:[#allocation2 + $0x8] sm:$0xff] %vm223_vm1, %v1137_v3  ;;  %224 = vst.msk [vmem:[#allocation2] sm:$0xff] %vm223_vm1, %v1137_v3  ;;  %s944_s26 = sshll.u32 %s1469_s20, 3  ;;  %v1319_v0 = vld [vmem:[%s1461_s2] ss:$0 sm:$0xff] }
   0xf   : > { %226 = vst.msk [vmem:[#allocation2 + $0x10] sm:$0xff] %vm223_vm1, %v1137_v3  ;;  %227 = vst.msk [vmem:[#allocation2 + $0x18] sm:$0xff] %vm223_vm1, %v1137_v3  ;;  %1022 = vmatprep.subr.mxu0 %v323_v1  ;;  %1079 = vmatprep.subr.mxu1 %v323_v1  ;;  %s1244_s4 = scalar_lea.vmem %s1459_s0, %s944_s26  ;;  %s1332_s9 = scalar_lea.vmem %s1462_s3, %s944_s26 }
  0x10   : > { %228 = vst.msk [vmem:[#allocation2 + $0x20] sm:$0xff] %vm223_vm1, %v1137_v3  ;;  %229 = vst.msk [vmem:[#allocation2 + $0x28] sm:$0xff] %vm223_vm1, %v1137_v3  ;;  %1023 = vmatpush3.msra.mxu0 %v323_v1  ;;  %1084 = vmatpush3.msra.mxu1 %v323_v1  ;;  %v288_v6 = vld [vmem:[%s1244_s4] sm:$0xff]  ;;  %v289_v8 = vld [vmem:[%s1244_s4 + $0x8] sm:$0xff] }
  0x11   : > { %230 = vst.msk [vmem:[#allocation2 + $0x30] sm:$0xff] %vm223_vm1, %v1137_v3  ;;  %231 = vst.msk [vmem:[#allocation2 + $0x38] sm:$0xff] %vm223_vm1, %v1137_v3  ;;  %1024 = vmatprep.subr.mxu0 %v322_v2  ;;  %1080 = vmatprep.subr.mxu1 %v322_v2  ;;  %v304_v7 = vld [vmem:[%s1244_s4 + $0x80] sm:$0xff]  ;;  %v305_v9 = vld [vmem:[%s1244_s4 + $0x88] sm:$0xff] }
  0x12   : > { %232 = vst.msk [vmem:[#allocation2 + $0x40] sm:$0xff] %vm223_vm1, %v1137_v3  ;;  %233 = vst.msk [vmem:[#allocation2 + $0x48] sm:$0xff] %vm223_vm1, %v1137_v3  ;;  %1025 = vmatpush3.msra.mxu0 %v322_v2  ;;  %1085 = vmatpush3.msra.mxu1 %v322_v2  ;;  %v290_v10 = vld [vmem:[%s1244_s4 + $0x10] sm:$0xff]  ;;  %v291_v12 = vld [vmem:[%s1244_s4 + $0x18] sm:$0xff] }
  0x13   : > { %234 = vst.msk [vmem:[#allocation2 + $0x50] sm:$0xff] %vm223_vm1, %v1137_v3  ;;  %235 = vst.msk [vmem:[#allocation2 + $0x58] sm:$0xff] %vm223_vm1, %v1137_v3  ;;  %1026 = vmatprep.subr.mxu0 %v321_v4  ;;  %1081 = vmatprep.subr.mxu1 %v321_v4  ;;  %v306_v11 = vld [vmem:[%s1244_s4 + $0x90] sm:$0xff]  ;;  %v307_v13 = vld [vmem:[%s1244_s4 + $0x98] sm:$0xff] }
  0x14   : > { %236 = vst.msk [vmem:[#allocation2 + $0x60] sm:$0xff] %vm223_vm1, %v1137_v3  ;;  %237 = vst.msk [vmem:[#allocation2 + $0x68] sm:$0xff] %vm223_vm1, %v1137_v3  ;;  %1027 = vmatpush3.msra.mxu0 %v321_v4  ;;  %1086 = vmatpush3.msra.mxu1 %v321_v4  ;;  %v292_v14 = vld [vmem:[%s1244_s4 + $0x20] sm:$0xff]  ;;  %v293_v16 = vld [vmem:[%s1244_s4 + $0x28] sm:$0xff] }
  0x15   : > { %238 = vst.msk [vmem:[#allocation2 + $0x70] sm:$0xff] %vm223_vm1, %v1137_v3  ;;  %239 = vst.msk [vmem:[#allocation2 + $0x78] sm:$0xff] %vm223_vm1, %v1137_v3  ;;  %1028 = vmatprep.subr.mxu0 %v320_v5  ;;  %1082 = vmatprep.subr.mxu1 %v320_v5  ;;  %v308_v15 = vld [vmem:[%s1244_s4 + $0xa0] sm:$0xff]  ;;  %v309_v17 = vld [vmem:[%s1244_s4 + $0xa8] sm:$0xff] }
  0x16   : > { %240 = vst.msk [vmem:[#allocation2 + $0x80] sm:$0xff] %vm223_vm1, %v1137_v3  ;;  %241 = vst.msk [vmem:[#allocation2 + $0x88] sm:$0xff] %vm223_vm1, %v1137_v3  ;;  %1029 = vmatpush3.msra.mxu0 %v320_v5  ;;  %1087 = vmatpush3.msra.mxu1 %v320_v5  ;;  %v294_v18 = vld [vmem:[%s1244_s4 + $0x30] sm:$0xff]  ;;  %v295_v20 = vld [vmem:[%s1244_s4 + $0x38] sm:$0xff] }
  0x17   : > { %242 = vst.msk [vmem:[#allocation2 + $0x90] sm:$0xff] %vm223_vm1, %v1137_v3  ;;  %243 = vst.msk [vmem:[#allocation2 + $0x98] sm:$0xff] %vm223_vm1, %v1137_v3  ;;  %1030 = vmatprep.mubr.msk.f32.mxu0 %vm325_vm2, %v288_v6  ;;  %1054 = vmatprep.mubr.msk.f32.mxu1 %vm325_vm2, %v304_v7  ;;  %v310_v19 = vld [vmem:[%s1244_s4 + $0xb0] sm:$0xff]  ;;  %v311_v21 = vld [vmem:[%s1244_s4 + $0xb8] sm:$0xff] }
  0x18   : > { %244 = vst.msk [vmem:[#allocation2 + $0xa0] sm:$0xff] %vm223_vm1, %v1137_v3  ;;  %245 = vst.msk [vmem:[#allocation2 + $0xa8] sm:$0xff] %vm223_vm1, %v1137_v3  ;;  %1031 = vmatmul.mubr.msk.f32.vlgmr.msra.gmra.mxu0 %vm325_vm2, %v289_v8  ;;  %1055 = vmatmul.mubr.msk.f32.vlgmr.msra.gmra.mxu1 %vm325_vm2, %v305_v9  ;;  %v296_v22 = vld [vmem:[%s1244_s4 + $0x40] sm:$0xff]  ;;  %v297_v24 = vld [vmem:[%s1244_s4 + $0x48] sm:$0xff] }
  0x19   : > { %246 = vst.msk [vmem:[#allocation2 + $0xb0] sm:$0xff] %vm223_vm1, %v1137_v3  ;;  %247 = vst.msk [vmem:[#allocation2 + $0xb8] sm:$0xff] %vm223_vm1, %v1137_v3  ;;  %1033 = vmatprep.mubr.msk.f32.mxu0 %vm325_vm2, %v290_v10  ;;  %1057 = vmatprep.mubr.msk.f32.mxu1 %vm325_vm2, %v306_v11  ;;  %v312_v23 = vld [vmem:[%s1244_s4 + $0xc0] sm:$0xff]  ;;  %v313_v25 = vld [vmem:[%s1244_s4 + $0xc8] sm:$0xff] }
  0x1a   : > { %248 = vst.msk [vmem:[#allocation2 + $0xc0] sm:$0xff] %vm223_vm1, %v1137_v3  ;;  %249 = vst.msk [vmem:[#allocation2 + $0xc8] sm:$0xff] %vm223_vm1, %v1137_v3  ;;  %v298_v26 = vld [vmem:[%s1244_s4 + $0x50] sm:$0xff]  ;;  %v299_v28 = vld [vmem:[%s1244_s4 + $0x58] sm:$0xff] }
  0x1b   : > { %250 = vst.msk [vmem:[#allocation2 + $0xd0] sm:$0xff] %vm223_vm1, %v1137_v3  ;;  %251 = vst.msk [vmem:[#allocation2 + $0xd8] sm:$0xff] %vm223_vm1, %v1137_v3  ;;  %v314_v27 = vld [vmem:[%s1244_s4 + $0xd0] sm:$0xff]  ;;  %v315_v29 = vld [vmem:[%s1244_s4 + $0xd8] sm:$0xff] }
  0x1c   : > { %252 = vst.msk [vmem:[#allocation2 + $0xe0] sm:$0xff] %vm223_vm1, %v1137_v3  ;;  %253 = vst.msk [vmem:[#allocation2 + $0xe8] sm:$0xff] %vm223_vm1, %v1137_v3  ;;  %1034 = vmatmul.mubr.msk.f32.gmra.mxu0 %vm325_vm2, %v291_v12  ;;  %1058 = vmatmul.mubr.msk.f32.gmra.mxu1 %vm325_vm2, %v307_v13  ;;  %v300_v30 = vld [vmem:[%s1244_s4 + $0x60] sm:$0xff]  ;;  %v301_v32 = vld [vmem:[%s1244_s4 + $0x68] sm:$0xff] }
  0x1d   : > { %254 = vst.msk [vmem:[#allocation2 + $0xf0] sm:$0xff] %vm223_vm1, %v1137_v3  ;;  %255 = vst.msk [vmem:[#allocation2 + $0xf8] sm:$0xff] %vm223_vm1, %v1137_v3  ;;  %1036 = vmatprep.mubr.msk.f32.mxu0 %vm325_vm2, %v292_v14  ;;  %1060 = vmatprep.mubr.msk.f32.mxu1 %vm325_vm2, %v308_v15  ;;  %v316_v31 = vld [vmem:[%s1244_s4 + $0xe0] sm:$0xff]  ;;  %v317_v33 = vld [vmem:[%s1244_s4 + $0xe8] sm:$0xff] }
  0x1e   : > { %v302_v34 = vld [vmem:[%s1244_s4 + $0x70] sm:$0xff]  ;;  %v303_v36 = vld [vmem:[%s1244_s4 + $0x78] sm:$0xff]  ;;  %v257_v38 = vld [vmem:[#allocation2 + $0x8] sm:$0xff] }
  0x1f   : > { %v318_v35 = vld [vmem:[%s1244_s4 + $0xf0] sm:$0xff]  ;;  %v319_v37 = vld [vmem:[%s1244_s4 + $0xf8] sm:$0xff]  ;;  %v273_v39 = vld [vmem:[#allocation2 + $0x88] sm:$0xff] }
  0x20   : > { %1037 = vmatmul.mubr.msk.f32.gmra.mxu0 %vm325_vm2, %v293_v16  ;;  %1061 = vmatmul.mubr.msk.f32.gmra.mxu1 %vm325_vm2, %v309_v17  ;;  %v256_v42 = vld [vmem:[#allocation2] sm:$0xff]  ;;  %v259_v48 = vld [vmem:[#allocation2 + $0x18] sm:$0xff]  ;;  %v258_v54 = vld [vmem:[#allocation2 + $0x10] sm:$0xff] }
  0x21   : > { %1039 = vmatprep.mubr.msk.f32.mxu0 %vm325_vm2, %v294_v18  ;;  %1063 = vmatprep.mubr.msk.f32.mxu1 %vm325_vm2, %v310_v19  ;;  %v272_v43 = vld [vmem:[#allocation2 + $0x80] sm:$0xff]  ;;  %v275_v49 = vld [vmem:[#allocation2 + $0x98] sm:$0xff]  ;;  %v274_v55 = vld [vmem:[#allocation2 + $0x90] sm:$0xff] }
  0x22   : > { %v261_v60 = vld [vmem:[#allocation2 + $0x28] sm:$0xff]  ;;  %v260_v3 = vld [vmem:[#allocation2 + $0x20] sm:$0xff]  ;;  %v263_v15 = vld [vmem:[#allocation2 + $0x38] sm:$0xff] }
  0x23   : > { %v277_v61 = vld [vmem:[#allocation2 + $0xa8] sm:$0xff]  ;;  %v276_v4 = vld [vmem:[#allocation2 + $0xa0] sm:$0xff]  ;;  %v279_v16 = vld [vmem:[#allocation2 + $0xb8] sm:$0xff] }
  0x24   : > { %1040 = vmatmul.mubr.msk.f32.gmra.mxu0 %vm325_vm2, %v295_v20  ;;  %1064 = vmatmul.mubr.msk.f32.gmra.mxu1 %vm325_vm2, %v311_v21 }
  0x25   : > { %1042 = vmatprep.mubr.msk.f32.mxu0 %vm325_vm2, %v296_v22  ;;  %1066 = vmatprep.mubr.msk.f32.mxu1 %vm325_vm2, %v312_v23 }
  0x28   : > { %1043 = vmatmul.mubr.msk.f32.gmra.mxu0 %vm325_vm2, %v297_v24  ;;  %1067 = vmatmul.mubr.msk.f32.gmra.mxu1 %vm325_vm2, %v313_v25  ;;  %v262_v25 = vld [vmem:[#allocation2 + $0x30] sm:$0xff] }
  0x29   : > { %1045 = vmatprep.mubr.msk.f32.mxu0 %vm325_vm2, %v298_v26  ;;  %1069 = vmatprep.mubr.msk.f32.mxu1 %vm325_vm2, %v314_v27  ;;  %v278_v26 = vld [vmem:[#allocation2 + $0xb0] sm:$0xff] }
  0x2c   : > { %1046 = vmatmul.mubr.msk.f32.gmra.mxu0 %vm325_vm2, %v299_v28  ;;  %1070 = vmatmul.mubr.msk.f32.gmra.mxu1 %vm325_vm2, %v315_v29 }
  0x2d   : > { %1048 = vmatprep.mubr.msk.f32.mxu0 %vm325_vm2, %v300_v30  ;;  %1072 = vmatprep.mubr.msk.f32.mxu1 %vm325_vm2, %v316_v31 }
  0x30   : > { %1049 = vmatmul.mubr.msk.f32.gmra.mxu0 %vm325_vm2, %v301_v32  ;;  %1073 = vmatmul.mubr.msk.f32.gmra.mxu1 %vm325_vm2, %v317_v33 }
  0x31   : > { %1051 = vmatprep.mubr.msk.f32.mxu0 %vm325_vm2, %v302_v34  ;;  %1075 = vmatprep.mubr.msk.f32.mxu1 %vm325_vm2, %v318_v35 }
  0x34   : > { %1052 = vmatmul.mubr.msk.f32.gmra.mxu0 %vm325_vm2, %v303_v36  ;;  %1076 = vmatmul.mubr.msk.f32.gmra.mxu1 %vm325_vm2, %v319_v37  ;;  %v265_v37 = vld [vmem:[#allocation2 + $0x48] sm:$0xff] }
  0xd8   : > { %v1032_v40 = vpop.f32.mrf.mxu0  ;;  %v1056_v41 = vpop.f32.mrf.mxu1 }
  0xd9   : > { %v652_v44 = vadd.f32 %v1032_v40, %v257_v38  ;;  %v668_v45 = vadd.f32 %v1056_v41, %v273_v39  ;;  %v281_v38 = vld [vmem:[#allocation2 + $0xc8] sm:$0xff] }
  0xda   : > { %v492_v46 = vpop.f32.mrf.mxu0  ;;  %v572_v47 = vpop.f32.mrf.mxu1 }
  0xdb   : > { %685 = vst.msk [vmem:[#allocation2 + $0x8] sm:$0xff] %vm223_vm1, %v652_v44  ;;  %701 = vst.msk [vmem:[#allocation2 + $0x88] sm:$0xff] %vm223_vm1, %v668_v45  ;;  %v651_v50 = vadd.f32 %v492_v46, %v256_v42  ;;  %v667_v51 = vadd.f32 %v572_v47, %v272_v43 }
  0xdc   : > { %v1035_v52 = vpop.f32.mrf.mxu0  ;;  %v1059_v53 = vpop.f32.mrf.mxu1 }
  0xdd   : > { %684 = vst.msk [vmem:[#allocation2] sm:$0xff] %vm223_vm1, %v651_v50  ;;  %700 = vst.msk [vmem:[#allocation2 + $0x80] sm:$0xff] %vm223_vm1, %v667_v51  ;;  %v654_v56 = vadd.f32 %v1035_v52, %v259_v48  ;;  %v670_v57 = vadd.f32 %v1059_v53, %v275_v49  ;;  %v264_v49 = vld [vmem:[#allocation2 + $0x40] sm:$0xff] }
  0xde   : > { %v502_v58 = vpop.f32.mrf.mxu0  ;;  %v582_v59 = vpop.f32.mrf.mxu1  ;;  %v280_v50 = vld [vmem:[#allocation2 + $0xc0] sm:$0xff] }
  0xdf   : > { %687 = vst.msk [vmem:[#allocation2 + $0x18] sm:$0xff] %vm223_vm1, %v654_v56  ;;  %703 = vst.msk [vmem:[#allocation2 + $0x98] sm:$0xff] %vm223_vm1, %v670_v57  ;;  %v653_v62 = vadd.f32 %v502_v58, %v258_v54  ;;  %v669_v63 = vadd.f32 %v582_v59, %v274_v55 }
  0xe0   : > { %v1038_v1 = vpop.f32.mrf.mxu0  ;;  %v1062_v2 = vpop.f32.mrf.mxu1 }
  0xe1   : > { %686 = vst.msk [vmem:[#allocation2 + $0x10] sm:$0xff] %vm223_vm1, %v653_v62  ;;  %702 = vst.msk [vmem:[#allocation2 + $0x90] sm:$0xff] %vm223_vm1, %v669_v63  ;;  %v656_v5 = vadd.f32 %v1038_v1, %v261_v60  ;;  %v672_v6 = vadd.f32 %v1062_v2, %v277_v61  ;;  %v267_v61 = vld [vmem:[#allocation2 + $0x58] sm:$0xff]  ;;  %v266_v63 = vld [vmem:[#allocation2 + $0x50] sm:$0xff] }
  0xe2   : > { %v720_v7 = vld [vmem:[#allocation2 + $0x8] sm:$0xff]  ;;  %v512_v9 = vpop.f32.mrf.mxu0  ;;  %v592_v10 = vpop.f32.mrf.mxu1  ;;  %v283_v62 = vld [vmem:[#allocation2 + $0xd8] sm:$0xff] }
  0xe3   : > { %v736_v8 = vld [vmem:[#allocation2 + $0x88] sm:$0xff]  ;;  %v759_v11 = vadd.f32 %v1319_v0, %v720_v7  ;;  %689 = vst.msk [vmem:[#allocation2 + $0x28] sm:$0xff] %vm223_vm1, %v656_v5  ;;  %705 = vst.msk [vmem:[#allocation2 + $0xa8] sm:$0xff] %vm223_vm1, %v672_v6  ;;  %v655_v13 = vadd.f32 %v512_v9, %v260_v3  ;;  %v671_v14 = vadd.f32 %v592_v10, %v276_v4  ;;  %v282_v7 = vld [vmem:[#allocation2 + $0xd0] sm:$0xff] }
  0xe4   : > { %v775_v12 = vadd.f32 %v1319_v0, %v736_v8  ;;  %v719_v17 = vld [vmem:[#allocation2] sm:$0xff]  ;;  %v1041_v19 = vpop.f32.mrf.mxu0  ;;  %v1065_v20 = vpop.f32.mrf.mxu1 }
  0xe5   : > { %v735_v18 = vld [vmem:[#allocation2 + $0x80] sm:$0xff]  ;;  %v791_v21 = vmax.f32 %v759_v11, 0.0  ;;  %v758_v23 = vadd.f32 %v1319_v0, %v719_v17  ;;  %688 = vst.msk [vmem:[#allocation2 + $0x20] sm:$0xff] %vm223_vm1, %v655_v13  ;;  %704 = vst.msk [vmem:[#allocation2 + $0xa0] sm:$0xff] %vm223_vm1, %v671_v14  ;;  %v658_v29 = vadd.f32 %v1041_v19, %v263_v15  ;;  %v674_v30 = vadd.f32 %v1065_v20, %v279_v16  ;;  %v269_v16 = vld [vmem:[#allocation2 + $0x68] sm:$0xff] }
  0xe6   : > { %v807_v22 = vmax.f32 %v775_v12, 0.0  ;;  %v774_v24 = vadd.f32 %v1319_v0, %v735_v18  ;;  %v722_v27 = vld [vmem:[#allocation2 + $0x18] sm:$0xff]  ;;  %v522_v31 = vpop.f32.mrf.mxu0  ;;  %v602_v32 = vpop.f32.mrf.mxu1  ;;  %v285_v17 = vld [vmem:[#allocation2 + $0xe8] sm:$0xff] }
  0xe7   : > { %v738_v28 = vld [vmem:[#allocation2 + $0x98] sm:$0xff]  ;;  %823 = vst.msk [vmem:[%s1332_s9 + $0x8] sm:$0xff] %vm223_vm1, %v791_v21  ;;  %v790_v33 = vmax.f32 %v758_v23, 0.0  ;;  %v761_v35 = vadd.f32 %v1319_v0, %v722_v27  ;;  %691 = vst.msk [vmem:[#allocation2 + $0x38] sm:$0xff] %vm223_vm1, %v658_v29  ;;  %v657_v41 = vadd.f32 %v522_v31, %v262_v25  ;;  %v673_v42 = vadd.f32 %v602_v32, %v278_v26  ;;  %v284_v29 = vld [vmem:[#allocation2 + $0xe0] sm:$0xff] }
  0xe8   : > { %839 = vst.msk [vmem:[%s1332_s9 + $0x88] sm:$0xff] %vm223_vm1, %v807_v22  ;;  %v806_v34 = vmax.f32 %v774_v24, 0.0  ;;  %v777_v36 = vadd.f32 %v1319_v0, %v738_v28  ;;  %v721_v39 = vld [vmem:[#allocation2 + $0x10] sm:$0xff]  ;;  %707 = vst.msk [vmem:[#allocation2 + $0xb8] sm:$0xff] %vm223_vm1, %v674_v30  ;;  %v1044_v43 = vpop.f32.mrf.mxu0  ;;  %v1068_v44 = vpop.f32.mrf.mxu1  ;;  %v268_v28 = vld [vmem:[#allocation2 + $0x60] sm:$0xff] }
  0xe9   : > { %v737_v40 = vld [vmem:[#allocation2 + $0x90] sm:$0xff]  ;;  %822 = vst.msk [vmem:[%s1332_s9] sm:$0xff] %vm223_vm1, %v790_v33  ;;  %v793_v45 = vmax.f32 %v761_v35, 0.0  ;;  %v760_v47 = vadd.f32 %v1319_v0, %v721_v39  ;;  %690 = vst.msk [vmem:[#allocation2 + $0x30] sm:$0xff] %vm223_vm1, %v657_v41  ;;  %v660_v53 = vadd.f32 %v1044_v43, %v265_v37  ;;  %v676_v54 = vadd.f32 %v1068_v44, %v281_v38  ;;  %v287_v41 = vld [vmem:[#allocation2 + $0xf8] sm:$0xff] }
  0xea   : > { %838 = vst.msk [vmem:[%s1332_s9 + $0x80] sm:$0xff] %vm223_vm1, %v806_v34  ;;  %v809_v46 = vmax.f32 %v777_v36, 0.0  ;;  %v776_v48 = vadd.f32 %v1319_v0, %v737_v40  ;;  %v724_v51 = vld [vmem:[#allocation2 + $0x28] sm:$0xff]  ;;  %706 = vst.msk [vmem:[#allocation2 + $0xb0] sm:$0xff] %vm223_vm1, %v673_v42  ;;  %v532_v55 = vpop.f32.mrf.mxu0  ;;  %v612_v56 = vpop.f32.mrf.mxu1  ;;  %v271_v40 = vld [vmem:[#allocation2 + $0x78] sm:$0xff] }
  0xeb   : > { %v740_v52 = vld [vmem:[#allocation2 + $0xa8] sm:$0xff]  ;;  %825 = vst.msk [vmem:[%s1332_s9 + $0x18] sm:$0xff] %vm223_vm1, %v793_v45  ;;  %v792_v57 = vmax.f32 %v760_v47, 0.0  ;;  %v763_v59 = vadd.f32 %v1319_v0, %v724_v51  ;;  %693 = vst.msk [vmem:[#allocation2 + $0x48] sm:$0xff] %vm223_vm1, %v660_v53  ;;  %v659_v3 = vadd.f32 %v532_v55, %v264_v49  ;;  %v675_v4 = vadd.f32 %v612_v56, %v280_v50  ;;  %v286_v53 = vld [vmem:[#allocation2 + $0xf0] sm:$0xff] }
  0xec   : > { %841 = vst.msk [vmem:[%s1332_s9 + $0x98] sm:$0xff] %vm223_vm1, %v809_v46  ;;  %v808_v58 = vmax.f32 %v776_v48, 0.0  ;;  %v779_v60 = vadd.f32 %v1319_v0, %v740_v52  ;;  %v723_v1 = vld [vmem:[#allocation2 + $0x20] sm:$0xff]  ;;  %709 = vst.msk [vmem:[#allocation2 + $0xc8] sm:$0xff] %vm223_vm1, %v676_v54  ;;  %v1047_v5 = vpop.f32.mrf.mxu0  ;;  %v1071_v6 = vpop.f32.mrf.mxu1  ;;  %v270_v52 = vld [vmem:[#allocation2 + $0x70] sm:$0xff] }
  0xed   : > { %v739_v2 = vld [vmem:[#allocation2 + $0xa0] sm:$0xff]  ;;  %824 = vst.msk [vmem:[%s1332_s9 + $0x10] sm:$0xff] %vm223_vm1, %v792_v57  ;;  %v795_v8 = vmax.f32 %v763_v59, 0.0  ;;  %v762_v10 = vadd.f32 %v1319_v0, %v723_v1  ;;  %692 = vst.msk [vmem:[#allocation2 + $0x40] sm:$0xff] %vm223_vm1, %v659_v3  ;;  %v662_v12 = vadd.f32 %v1047_v5, %v267_v61  ;;  %v678_v13 = vadd.f32 %v1071_v6, %v283_v62 }
  0xee   : > { %840 = vst.msk [vmem:[%s1332_s9 + $0x90] sm:$0xff] %vm223_vm1, %v808_v58  ;;  %v811_v9 = vmax.f32 %v779_v60, 0.0  ;;  %v778_v11 = vadd.f32 %v1319_v0, %v739_v2  ;;  %708 = vst.msk [vmem:[#allocation2 + $0xc0] sm:$0xff] %vm223_vm1, %v675_v4  ;;  %v542_v14 = vpop.f32.mrf.mxu0  ;;  %v622_v15 = vpop.f32.mrf.mxu1  ;;  %v726_v20 = vld [vmem:[#allocation2 + $0x38] sm:$0xff] }
  0xef   : > { %827 = vst.msk [vmem:[%s1332_s9 + $0x28] sm:$0xff] %vm223_vm1, %v795_v8  ;;  %v794_v18 = vmax.f32 %v762_v10, 0.0  ;;  %v742_v21 = vld [vmem:[#allocation2 + $0xb8] sm:$0xff]  ;;  %v661_v22 = vadd.f32 %v542_v14, %v266_v63  ;;  %v677_v23 = vadd.f32 %v622_v15, %v282_v7  ;;  %v765_v24 = vadd.f32 %v1319_v0, %v726_v20  ;;  %695 = vst.msk [vmem:[#allocation2 + $0x58] sm:$0xff] %vm223_vm1, %v662_v12 }
  0xf0   : > { %843 = vst.msk [vmem:[%s1332_s9 + $0xa8] sm:$0xff] %vm223_vm1, %v811_v9  ;;  %v810_v19 = vmax.f32 %v778_v11, 0.0  ;;  %v781_v25 = vadd.f32 %v1319_v0, %v742_v21  ;;  %711 = vst.msk [vmem:[#allocation2 + $0xd8] sm:$0xff] %vm223_vm1, %v678_v13  ;;  %v1050_v26 = vpop.f32.mrf.mxu0  ;;  %v1074_v27 = vpop.f32.mrf.mxu1  ;;  %v725_v30 = vld [vmem:[#allocation2 + $0x30] sm:$0xff] }
  0xf1   : > { %826 = vst.msk [vmem:[%s1332_s9 + $0x20] sm:$0xff] %vm223_vm1, %v794_v18  ;;  %v741_v31 = vld [vmem:[#allocation2 + $0xb0] sm:$0xff]  ;;  %694 = vst.msk [vmem:[#allocation2 + $0x50] sm:$0xff] %vm223_vm1, %v661_v22  ;;  %v664_v32 = vadd.f32 %v1050_v26, %v269_v16  ;;  %v680_v33 = vadd.f32 %v1074_v27, %v285_v17  ;;  %v797_v34 = vmax.f32 %v765_v24, 0.0  ;;  %v764_v36 = vadd.f32 %v1319_v0, %v725_v30 }
  0xf2   : > { %842 = vst.msk [vmem:[%s1332_s9 + $0xa0] sm:$0xff] %vm223_vm1, %v810_v19  ;;  %710 = vst.msk [vmem:[#allocation2 + $0xd0] sm:$0xff] %vm223_vm1, %v677_v23  ;;  %v813_v35 = vmax.f32 %v781_v25, 0.0  ;;  %v780_v37 = vadd.f32 %v1319_v0, %v741_v31  ;;  %v552_v38 = vpop.f32.mrf.mxu0  ;;  %v632_v39 = vpop.f32.mrf.mxu1  ;;  %v728_v42 = vld [vmem:[#allocation2 + $0x48] sm:$0xff] }
  0xf3   : > { %v744_v43 = vld [vmem:[#allocation2 + $0xc8] sm:$0xff]  ;;  %697 = vst.msk [vmem:[#allocation2 + $0x68] sm:$0xff] %vm223_vm1, %v664_v32  ;;  %713 = vst.msk [vmem:[#allocation2 + $0xe8] sm:$0xff] %vm223_vm1, %v680_v33  ;;  %v663_v44 = vadd.f32 %v552_v38, %v268_v28  ;;  %v679_v45 = vadd.f32 %v632_v39, %v284_v29  ;;  %v796_v46 = vmax.f32 %v764_v36, 0.0  ;;  %v767_v48 = vadd.f32 %v1319_v0, %v728_v42 }
  0xf4   : > { %829 = vst.msk [vmem:[%s1332_s9 + $0x38] sm:$0xff] %vm223_vm1, %v797_v34  ;;  %845 = vst.msk [vmem:[%s1332_s9 + $0xb8] sm:$0xff] %vm223_vm1, %v813_v35  ;;  %v812_v47 = vmax.f32 %v780_v37, 0.0  ;;  %v783_v49 = vadd.f32 %v1319_v0, %v744_v43  ;;  %v1053_v50 = vpop.f32.mrf.mxu0  ;;  %v1077_v51 = vpop.f32.mrf.mxu1  ;;  %v727_v54 = vld [vmem:[#allocation2 + $0x40] sm:$0xff] }
  0xf5   : > { %v743_v55 = vld [vmem:[#allocation2 + $0xc0] sm:$0xff]  ;;  %696 = vst.msk [vmem:[#allocation2 + $0x60] sm:$0xff] %vm223_vm1, %v663_v44  ;;  %712 = vst.msk [vmem:[#allocation2 + $0xe0] sm:$0xff] %vm223_vm1, %v679_v45  ;;  %v666_v56 = vadd.f32 %v1053_v50, %v271_v40  ;;  %v682_v57 = vadd.f32 %v1077_v51, %v287_v41  ;;  %v799_v58 = vmax.f32 %v767_v48, 0.0  ;;  %v766_v60 = vadd.f32 %v1319_v0, %v727_v54 }
  0xf6   : > { %828 = vst.msk [vmem:[%s1332_s9 + $0x30] sm:$0xff] %vm223_vm1, %v796_v46  ;;  %844 = vst.msk [vmem:[%s1332_s9 + $0xb0] sm:$0xff] %vm223_vm1, %v812_v47  ;;  %v815_v59 = vmax.f32 %v783_v49, 0.0  ;;  %v782_v61 = vadd.f32 %v1319_v0, %v743_v55  ;;  %v562_v62 = vpop.f32.mrf.mxu0  ;;  %v642_v63 = vpop.f32.mrf.mxu1  ;;  %v730_v1 = vld [vmem:[#allocation2 + $0x58] sm:$0xff] }
  0xf7   : > { %v746_v2 = vld [vmem:[#allocation2 + $0xd8] sm:$0xff]  ;;  %699 = vst.msk [vmem:[#allocation2 + $0x78] sm:$0xff] %vm223_vm1, %v666_v56  ;;  %715 = vst.msk [vmem:[#allocation2 + $0xf8] sm:$0xff] %vm223_vm1, %v682_v57  ;;  %v665_v3 = vadd.f32 %v562_v62, %v270_v52  ;;  %v681_v4 = vadd.f32 %v642_v63, %v286_v53  ;;  %v798_v5 = vmax.f32 %v766_v60, 0.0  ;;  %v769_v7 = vadd.f32 %v1319_v0, %v730_v1 }
  0xf8   : > { %831 = vst.msk [vmem:[%s1332_s9 + $0x48] sm:$0xff] %vm223_vm1, %v799_v58  ;;  %847 = vst.msk [vmem:[%s1332_s9 + $0xc8] sm:$0xff] %vm223_vm1, %v815_v59  ;;  %v814_v6 = vmax.f32 %v782_v61, 0.0  ;;  %v785_v8 = vadd.f32 %v1319_v0, %v746_v2  ;;  %v729_v9 = vld [vmem:[#allocation2 + $0x50] sm:$0xff] }
  0xf9   : > { %v745_v10 = vld [vmem:[#allocation2 + $0xd0] sm:$0xff]  ;;  %v768_v11 = vadd.f32 %v1319_v0, %v729_v9  ;;  %698 = vst.msk [vmem:[#allocation2 + $0x70] sm:$0xff] %vm223_vm1, %v665_v3  ;;  %714 = vst.msk [vmem:[#allocation2 + $0xf0] sm:$0xff] %vm223_vm1, %v681_v4  ;;  %v801_v13 = vmax.f32 %v769_v7, 0.0 }
  0xfa   : > { %v784_v12 = vadd.f32 %v1319_v0, %v745_v10  ;;  %830 = vst.msk [vmem:[%s1332_s9 + $0x40] sm:$0xff] %vm223_vm1, %v798_v5  ;;  %846 = vst.msk [vmem:[%s1332_s9 + $0xc0] sm:$0xff] %vm223_vm1, %v814_v6  ;;  %v817_v14 = vmax.f32 %v785_v8, 0.0  ;;  %v732_v15 = vld [vmem:[#allocation2 + $0x68] sm:$0xff] }
  0xfb   : > { %v748_v16 = vld [vmem:[#allocation2 + $0xe8] sm:$0xff]  ;;  %v800_v17 = vmax.f32 %v768_v11, 0.0  ;;  %v771_v19 = vadd.f32 %v1319_v0, %v732_v15  ;;  %833 = vst.msk [vmem:[%s1332_s9 + $0x58] sm:$0xff] %vm223_vm1, %v801_v13 }
  0xfc   : > { %v816_v18 = vmax.f32 %v784_v12, 0.0  ;;  %v787_v20 = vadd.f32 %v1319_v0, %v748_v16  ;;  %849 = vst.msk [vmem:[%s1332_s9 + $0xd8] sm:$0xff] %vm223_vm1, %v817_v14  ;;  %v731_v21 = vld [vmem:[#allocation2 + $0x60] sm:$0xff] }
  0xfd   : > { %v747_v22 = vld [vmem:[#allocation2 + $0xe0] sm:$0xff]  ;;  %832 = vst.msk [vmem:[%s1332_s9 + $0x50] sm:$0xff] %vm223_vm1, %v800_v17  ;;  %v803_v23 = vmax.f32 %v771_v19, 0.0  ;;  %v770_v25 = vadd.f32 %v1319_v0, %v731_v21 }
  0xfe   : > { %848 = vst.msk [vmem:[%s1332_s9 + $0xd0] sm:$0xff] %vm223_vm1, %v816_v18  ;;  %v819_v24 = vmax.f32 %v787_v20, 0.0  ;;  %v786_v26 = vadd.f32 %v1319_v0, %v747_v22  ;;  %v734_v27 = vld [vmem:[#allocation2 + $0x78] sm:$0xff] }
  0xff   : > { %v750_v28 = vld [vmem:[#allocation2 + $0xf8] sm:$0xff]  ;;  %835 = vst.msk [vmem:[%s1332_s9 + $0x68] sm:$0xff] %vm223_vm1, %v803_v23  ;;  %v802_v29 = vmax.f32 %v770_v25, 0.0  ;;  %v773_v31 = vadd.f32 %v1319_v0, %v734_v27 }
 0x100   : > { %851 = vst.msk [vmem:[%s1332_s9 + $0xe8] sm:$0xff] %vm223_vm1, %v819_v24  ;;  %v818_v30 = vmax.f32 %v786_v26, 0.0  ;;  %v789_v32 = vadd.f32 %v1319_v0, %v750_v28  ;;  %v733_v33 = vld [vmem:[#allocation2 + $0x70] sm:$0xff] }
 0x101   : > { %v749_v34 = vld [vmem:[#allocation2 + $0xf0] sm:$0xff]  ;;  %834 = vst.msk [vmem:[%s1332_s9 + $0x60] sm:$0xff] %vm223_vm1, %v802_v29  ;;  %v805_v35 = vmax.f32 %v773_v31, 0.0  ;;  %v772_v37 = vadd.f32 %v1319_v0, %v733_v33 }
 0x102   : > { %850 = vst.msk [vmem:[%s1332_s9 + $0xe0] sm:$0xff] %vm223_vm1, %v818_v30  ;;  %v821_v36 = vmax.f32 %v789_v32, 0.0  ;;  %v788_v38 = vadd.f32 %v1319_v0, %v749_v34 }
 0x103   : > { %837 = vst.msk [vmem:[%s1332_s9 + $0x78] sm:$0xff] %vm223_vm1, %v805_v35  ;;  %v804_v39 = vmax.f32 %v772_v37, 0.0 }
 0x104   : > { %853 = vst.msk [vmem:[%s1332_s9 + $0xf8] sm:$0xff] %vm223_vm1, %v821_v36  ;;  %v820_v40 = vmax.f32 %v788_v38, 0.0 }
 0x105   : > { %836 = vst.msk [vmem:[%s1332_s9 + $0x70] sm:$0xff] %vm223_vm1, %v804_v39 }
 0x106   : > { %852 = vst.msk [vmem:[%s1332_s9 + $0xf0] sm:$0xff] %vm223_vm1, %v820_v40 }
 0x107 PF: > { %s13_s14 = sadd.s32 1, %s1135_s14   ;;  %s1464_s12 = smov %s1131_s13 }
 0x108   : > { %p10_p5 = scmp.ge.s32.totalorder %s13_s14, 8   ;;  %s1465_s13 = smov %s1467_s15 }
 0x10a   :  { %12 = sbr.rel (!%p10_p5) target bundleno = 2 (0x2), region = 73 }

</bundles_post_ra>
